<compile_context>
chip_gen: v7x
topology: tpu7x:2x2x1
jax: 0.10.0
libtpu: 0.0.40
codegen_flags: <defaults>
</compile_context>

<pallas_src>
import jax
import jax.numpy as jnp
from jax.experimental import pallas as pl
from jax.experimental.pallas import tpu as pltpu

LEAKY_SLOPE = 0.2
LN_EPS = 1e-5
_TILE_ALIGN = 256  # fills native MXU M-passes on v5e/v6e/v7x


def _round_up(x, m):
    return ((x + m - 1) // m) * m


def _cdiv(a, b):
    return (a + b - 1) // b


def _leaky_relu(x):
    return jnp.where(x >= 0, x, LEAKY_SLOPE * x)


def _layer_norm_no_affine(x):
    # PyTorch LayerNorm core: biased variance over last dim, eps inside rsqrt.
    # (gamma/beta are folded into the following Linear on the host.)
    mu = jnp.mean(x, axis=-1, keepdims=True)
    var = jnp.mean((x - mu) * (x - mu), axis=-1, keepdims=True)
    return (x - mu) * jax.lax.rsqrt(var + LN_EPS)


# ---------------------------------------------------------------------------
# Kernel
# ---------------------------------------------------------------------------
def tabular_generator_kernel(z_ref, w1_ref, w2_ref, w3_ref, b_ref, out_ref):
    h1 = w1_ref.shape[1]
    h2 = w2_ref.shape[1]
    od = w3_ref.shape[1]
    mxu_dtype = w1_ref.dtype  # bf16 MXU operands, f32 accumulation

    # Linear(latent -> hidden) + LeakyReLU + LayerNorm (affine folded forward).
    x = z_ref[...].astype(mxu_dtype)
    h = jnp.dot(x, w1_ref[...], preferred_element_type=jnp.float32)
    h = h + b_ref[0:1, :h1]
    h = _layer_norm_no_affine(_leaky_relu(h))

    # Linear(hidden -> 2*hidden) (gamma1 folded into W2, beta1 into bias).
    h = jnp.dot(h.astype(mxu_dtype), w2_ref[...],
                preferred_element_type=jnp.float32)
    h = h + b_ref[1:2, :h2]
    h = _layer_norm_no_affine(_leaky_relu(h))

    # Linear(2*hidden -> output) (gamma2/beta2 folded) + Tanh.
    y = jnp.dot(h.astype(mxu_dtype), w3_ref[...],
                preferred_element_type=jnp.float32)
    y = y + b_ref[2:3, :od]
    out_ref[...] = jnp.tanh(y).astype(out_ref.dtype)


# ---------------------------------------------------------------------------
# Host-side helpers
# ---------------------------------------------------------------------------
def _vmem_capacity_bytes():
    try:
        info = pltpu.get_tpu_info()
        cap = getattr(info, "vmem_capacity_bytes", None)
        if cap:
            return int(cap)
    except Exception:
        pass
    return 64 * 2 ** 20  # conservative (v7x-sized) fallback


def _num_tensorcores_per_chip():
    try:
        kind = jax.devices()[0].device_kind.lower()
    except Exception:
        return 1
    return 2 if "v7" in kind else 1


def _choose_tile(batch, tile_b, num_tc):
    # Largest useful 256-aligned tile, never bigger than the (aligned) batch.
    tile = min(_round_up(max(tile_b, 1), _TILE_ALIGN),
               _round_up(max(batch, 1), _TILE_ALIGN))
    if num_tc >= 2 and batch > _TILE_ALIGN:
        # 2-TensorCore parts (v7x): keep >= 2 "parallel" grid steps when the
        # batch allows so both cores get work.
        tile = min(tile, _round_up(_cdiv(batch, 2), _TILE_ALIGN))
    return tile


def _fold_layer_norm_affine(params):
    """Fold LN gamma/beta into the following Linear, in f32."""
    w1, b1, g1, be1, w2, b2, g2, be2, w3, b3 = params
    w2f = w2 * jnp.reshape(g1, (-1, 1))
    b2f = be1 @ w2 + b2
    w3f = w3 * jnp.reshape(g2, (-1, 1))
    b3f = be2 @ w3 + b3
    return w1, b1, w2f, b2f, w3f, b3f


def _build_call(Bp, latent_dim, out_dim, tile_b, param_arrays, out_dtype):
    w1, w2, w3, bias_pack = param_arrays
    h1, h2 = w1.shape[1], w2.shape[1]

    in_specs = [pl.BlockSpec((tile_b, latent_dim), lambda i: (i, 0))]
    # Full-extent, constant-index parameter blocks: the block index never
    # changes across the grid, so Pallas keeps them resident (no re-DMA).
    for p in param_arrays:
        in_specs.append(pl.BlockSpec(p.shape, lambda i: (0, 0)))

    param_bytes = sum(int(p.size) * p.dtype.itemsize for p in param_arrays)
    flops = 2 * Bp * (latent_dim * h1 + h1 * h2 + h2 * out_dim)
    bytes_accessed = (param_bytes + Bp * latent_dim * 4 + Bp * out_dim * 4)
    cost = pl.CostEstimate(flops=int(flops),
                           transcendentals=int(Bp * (out_dim + 2)),
                           bytes_accessed=int(bytes_accessed))

    # TpuInfo-derived VMEM budget.
    cap = _vmem_capacity_bytes()
    resident = 2 * param_bytes                               # buffered params
    io_bufs = 2 * tile_b * (latent_dim + out_dim) * 4        # dbl-buffered z/out
    work = 2 * tile_b * (h1 + h2 + out_dim) * 4              # f32 intermediates
    need = resident + io_bufs + work
    if need > int(0.6 * cap):
        # TODO(synk): add a K-tiled reduction grid axis (tiled W2/W3 + f32 VMEM
        # accumulator, "arbitrary" semantics) for very large hidden_dim on v7x.
        raise ValueError(
            f"Resident weights + tiles (~{need >> 20} MiB) exceed the safe VMEM "
            f"budget for this chip ({cap >> 20} MiB); reduce hidden_dim/tile_b "
            "or add a K-tiled reduction path.")
    floor = 32 * 2 ** 20
    ceiling = max(floor, cap - 16 * 2 ** 20)
    vmem_limit = int(min(ceiling, max(floor, 2 * need)))

    return pl.pallas_call(
        tabular_generator_kernel,
        out_shape=jax.ShapeDtypeStruct((Bp, out_dim), out_dtype),
        grid_spec=pltpu.PrefetchScalarGridSpec(
            num_scalar_prefetch=0,
            grid=(Bp // tile_b,),
            in_specs=in_specs,
            out_specs=pl.BlockSpec((tile_b, out_dim), lambda i: (i, 0)),
        ),
        compiler_params=pltpu.CompilerParams(
            dimension_semantics=("parallel",),
            vmem_limit_bytes=vmem_limit,
        ),
        cost_estimate=cost,
    )


def tabular_generator(z, params, *, tile_b=1024):
    """Forward pass of TabularGenerator. z: [B, latent_dim] float32."""
    B, latent_dim = z.shape
    w1, b1, w2f, b2f, w3f, b3f = _fold_layer_norm_affine(params)
    h1, h2 = w1.shape[1], w2f.shape[1]
    out_dim = w3f.shape[1]

    tile = _choose_tile(B, tile_b, _num_tensorcores_per_chip())
    Bp = _round_up(B, tile)
    zp = z if Bp == B else jnp.pad(z, ((0, Bp - B), (0, 0)))

    # Pack the three bias rows into one small f32 block (fewer operands/DMAs).
    maxw = max(h1, h2, out_dim)
    bias_pack = jnp.zeros((3, maxw), jnp.float32)
    bias_pack = bias_pack.at[0, :h1].set(b1[0])
    bias_pack = bias_pack.at[1, :h2].set(b2f[0])
    bias_pack = bias_pack.at[2, :out_dim].set(b3f[0])

    param_arrays = (w1.astype(jnp.bfloat16), w2f.astype(jnp.bfloat16),
                    w3f.astype(jnp.bfloat16), bias_pack)

    call = _build_call(Bp, latent_dim, out_dim, tile, param_arrays, z.dtype)
    out = call(zp, *param_arrays)
    return out if Bp == B else out[:B]


# ---------------------------------------------------------------------------
# Parameter init + references
# ---------------------------------------------------------------------------
def init_params(key, latent_dim, output_dim, hidden_dim):
    """Parameters mirroring the nn.Module shapes (weights stored as [in, out])."""
    ks = jax.random.split(key, 10)

    def linear(kw, kb, fan_in, fan_out):
        bound = 1.0 / jnp.sqrt(fan_in)
        w = jax.random.uniform(kw, (fan_in, fan_out), jnp.float32, -bound, bound)
        b = jax.random.uniform(kb, (1, fan_out), jnp.float32, -bound, bound)
        return w, b

    w1, b1 = linear(ks[0], ks[1], latent_dim, hidden_dim)
    w2, b2 = linear(ks[2], ks[3], hidden_dim, hidden_dim * 2)
    w3, b3 = linear(ks[4], ks[5], hidden_dim * 2, output_dim)
    # Non-trivial LayerNorm affine params (PyTorch init is ones/zeros) so the
    # host-side gamma/beta fold is actually exercised by the checks.
    g1 = 1.0 + 0.1 * jax.random.normal(ks[6], (1, hidden_dim), jnp.float32)
    be1 = 0.1 * jax.random.normal(ks[7], (1, hidden_dim), jnp.float32)
    g2 = 1.0 + 0.1 * jax.random.normal(ks[8], (1, hidden_dim * 2), jnp.float32)
    be2 = 0.1 * jax.random.normal(ks[9], (1, hidden_dim * 2), jnp.float32)
    return (w1, b1, g1, be1, w2, b2, g2, be2, w3, b3)


def reference_forward(z, params):
    """Pure-f32 reference that mirrors the PyTorch module exactly."""
    w1, b1, g1, be1, w2, b2, g2, be2, w3, b3 = params

    def ln(x, g, b):
        mu = jnp.mean(x, axis=-1, keepdims=True)
        var = jnp.mean((x - mu) * (x - mu), axis=-1, keepdims=True)
        return (x - mu) * jax.lax.rsqrt(var + LN_EPS) * g + b

    h = ln(_leaky_relu(z @ w1 + b1), g1, be1)
    h = ln(_leaky_relu(h @ w2 + b2), g2, be2)
    return jnp.tanh(h @ w3 + b3)


def reference_forward_matched(z, params, mxu_dtype=jnp.bfloat16):
    """Reference that mirrors the kernel numerics (folded LN affine, bf16 MXU
    operands, f32 accumulation / elementwise)."""
    w1, b1, w2f, b2f, w3f, b3f = _fold_layer_norm_affine(params)

    def dot(a, w):
        return jnp.dot(a.astype(mxu_dtype), w.astype(mxu_dtype),
                       preferred_element_type=jnp.float32)

    h = _layer_norm_no_affine(_leaky_relu(dot(z, w1) + b1))
    h = _layer_norm_no_affine(_leaky_relu(dot(h, w2f) + b2f))
    return jnp.tanh(dot(h, w3f) + b3f)


if __name__ == "__main__":
    latent_dim, output_dim, hidden_dim = 16, 16, 32
    batch = 64

    key = jax.random.PRNGKey(0)
    k_params, k_z = jax.random.split(key)
    params = init_params(k_params, latent_dim, output_dim, hidden_dim)
    z = jax.random.normal(k_z, (batch, latent_dim), jnp.float32)

    out = jax.block_until_ready(tabular_generator(z, params))
    assert out.shape == (batch, output_dim)
    assert out.dtype == z.dtype

    # Tight check against a reference with identical (folded, bf16-MXU) numerics.
    ref_bf16 = reference_forward_matched(z, params, mxu_dtype=jnp.bfloat16)
    assert jnp.allclose(out, ref_bf16, atol=2e-3, rtol=2e-3), \
        "mismatch vs bf16-matched reference"

    # Loose check against the full-f32 PyTorch-equivalent forward.
    ref_f32 = reference_forward(z, params)
    assert jnp.allclose(out, ref_f32, atol=7.5e-2), "mismatch vs f32 reference"

    print("KERNEL_OK")
</pallas_src>

<mosaic_0001>
module attributes {stable_mosaic.version = 11 : i64} {
  func.func @tabular_generator_kernel(%arg0: i32, %arg1: memref<256x16xf32, #tpu.memory_space<vmem>>, %arg2: memref<16x32xbf16, #tpu.memory_space<vmem>>, %arg3: memref<32x64xbf16, #tpu.memory_space<vmem>>, %arg4: memref<64x16xbf16, #tpu.memory_space<vmem>>, %arg5: memref<3x64xf32, #tpu.memory_space<vmem>>, %arg6: memref<256x16xf32, #tpu.memory_space<vmem>>) attributes {dimension_semantics = [#tpu.dimension_semantics<parallel>], iteration_bounds = array<i64: 1>, scalar_prefetch = 0 : i64, scratch_operands = 0 : i64, tpu.core_type = #tpu.core_type<tc>, window_params = [{transform_indices = @transform_0, window_bounds = array<i64: 256, 16>}, {pipeline_mode = #tpu.pipeline_mode<synchronous>, transform_indices = @transform_1, window_bounds = array<i64: 16, 32>}, {pipeline_mode = #tpu.pipeline_mode<synchronous>, transform_indices = @transform_2, window_bounds = array<i64: 32, 64>}, {pipeline_mode = #tpu.pipeline_mode<synchronous>, transform_indices = @transform_3, window_bounds = array<i64: 64, 16>}, {pipeline_mode = #tpu.pipeline_mode<synchronous>, transform_indices = @transform_4, window_bounds = array<i64: 3, 64>}, {transform_indices = @transform_5, window_bounds = array<i64: 256, 16>}]} {
    %c0 = arith.constant 0 : index
    %c0_0 = arith.constant 0 : index
    %0 = vector.load %arg1[%c0, %c0_0] : memref<256x16xf32, #tpu.memory_space<vmem>>, vector<256x16xf32>
    %1 = arith.truncf %0 : vector<256x16xf32> to vector<256x16xbf16>
    %c0_1 = arith.constant 0 : index
    %c0_2 = arith.constant 0 : index
    %2 = vector.load %arg2[%c0_1, %c0_2] : memref<16x32xbf16, #tpu.memory_space<vmem>>, vector<16x32xbf16>
    %cst = arith.constant dense<0.000000e+00> : vector<256x32xf32>
    %3 = tpu.matmul %1, %2, %cst {dimension_numbers = #tpu.dot_dimension_numbers<[1], [0], [0], [1], [0, 0, 1, 1], [], []>} : vector<256x16xbf16>, vector<16x32xbf16>, vector<256x32xf32> -> vector<256x32xf32>
    %c0_3 = arith.constant 0 : index
    %c0_4 = arith.constant 0 : index
    %4 = vector.load %arg5[%c0_3, %c0_4] : memref<3x64xf32, #tpu.memory_space<vmem>>, vector<1x32xf32>
    %5 = vector.broadcast %4 : vector<1x32xf32> to vector<256x32xf32>
    %6 = arith.addf %3, %5 : vector<256x32xf32>
    %cst_5 = arith.constant 0.000000e+00 : f32
    %7 = vector.broadcast %cst_5 : f32 to vector<256x32xf32>
    %8 = arith.cmpf oge, %6, %7 : vector<256x32xf32>
    %cst_6 = arith.constant 2.000000e-01 : f32
    %9 = vector.broadcast %cst_6 : f32 to vector<256x32xf32>
    %10 = arith.mulf %9, %6 : vector<256x32xf32>
    %11 = arith.select %8, %6, %10 : vector<256x32xi1>, vector<256x32xf32>
    %cst_7 = arith.constant dense<0.000000e+00> : vector<256xf32>
    %12 = vector.multi_reduction <add>, %11, %cst_7 [1] : vector<256x32xf32> to vector<256xf32>
    %13 = vector.shape_cast %12 : vector<256xf32> to vector<256x1xf32>
    %cst_8 = arith.constant 3.200000e+01 : f32
    %14 = vector.broadcast %cst_8 : f32 to vector<256x1xf32>
    %15 = arith.divf %13, %14 : vector<256x1xf32>
    %16 = vector.broadcast %15 : vector<256x1xf32> to vector<256x32xf32>
    %17 = arith.subf %11, %16 : vector<256x32xf32>
    %18 = vector.broadcast %15 : vector<256x1xf32> to vector<256x32xf32>
    %19 = arith.subf %11, %18 : vector<256x32xf32>
    %20 = arith.mulf %17, %19 : vector<256x32xf32>
    %cst_9 = arith.constant dense<0.000000e+00> : vector<256xf32>
    %21 = vector.multi_reduction <add>, %20, %cst_9 [1] : vector<256x32xf32> to vector<256xf32>
    %22 = vector.shape_cast %21 : vector<256xf32> to vector<256x1xf32>
    %cst_10 = arith.constant 3.200000e+01 : f32
    %23 = vector.broadcast %cst_10 : f32 to vector<256x1xf32>
    %24 = arith.divf %22, %23 : vector<256x1xf32>
    %25 = vector.broadcast %15 : vector<256x1xf32> to vector<256x32xf32>
    %26 = arith.subf %11, %25 : vector<256x32xf32>
    %cst_11 = arith.constant 9.99999974E-6 : f32
    %27 = vector.broadcast %cst_11 : f32 to vector<256x1xf32>
    %28 = arith.addf %24, %27 : vector<256x1xf32>
    %29 = math.rsqrt %28 : vector<256x1xf32>
    %30 = vector.broadcast %29 : vector<256x1xf32> to vector<256x32xf32>
    %31 = arith.mulf %26, %30 : vector<256x32xf32>
    %32 = arith.truncf %31 : vector<256x32xf32> to vector<256x32xbf16>
    %c0_12 = arith.constant 0 : index
    %c0_13 = arith.constant 0 : index
    %33 = vector.load %arg3[%c0_12, %c0_13] : memref<32x64xbf16, #tpu.memory_space<vmem>>, vector<32x64xbf16>
    %cst_14 = arith.constant dense<0.000000e+00> : vector<256x64xf32>
    %34 = tpu.matmul %32, %33, %cst_14 {dimension_numbers = #tpu.dot_dimension_numbers<[1], [0], [0], [1], [0, 0, 1, 1], [], []>} : vector<256x32xbf16>, vector<32x64xbf16>, vector<256x64xf32> -> vector<256x64xf32>
    %c1 = arith.constant 1 : index
    %c0_15 = arith.constant 0 : index
    %35 = vector.load %arg5[%c1, %c0_15] : memref<3x64xf32, #tpu.memory_space<vmem>>, vector<1x64xf32>
    %36 = vector.broadcast %35 : vector<1x64xf32> to vector<256x64xf32>
    %37 = arith.addf %34, %36 : vector<256x64xf32>
    %cst_16 = arith.constant 0.000000e+00 : f32
    %38 = vector.broadcast %cst_16 : f32 to vector<256x64xf32>
    %39 = arith.cmpf oge, %37, %38 : vector<256x64xf32>
    %cst_17 = arith.constant 2.000000e-01 : f32
    %40 = vector.broadcast %cst_17 : f32 to vector<256x64xf32>
    %41 = arith.mulf %40, %37 : vector<256x64xf32>
    %42 = arith.select %39, %37, %41 : vector<256x64xi1>, vector<256x64xf32>
    %cst_18 = arith.constant dense<0.000000e+00> : vector<256xf32>
    %43 = vector.multi_reduction <add>, %42, %cst_18 [1] : vector<256x64xf32> to vector<256xf32>
    %44 = vector.shape_cast %43 : vector<256xf32> to vector<256x1xf32>
    %cst_19 = arith.constant 6.400000e+01 : f32
    %45 = vector.broadcast %cst_19 : f32 to vector<256x1xf32>
    %46 = arith.divf %44, %45 : vector<256x1xf32>
    %47 = vector.broadcast %46 : vector<256x1xf32> to vector<256x64xf32>
    %48 = arith.subf %42, %47 : vector<256x64xf32>
    %49 = vector.broadcast %46 : vector<256x1xf32> to vector<256x64xf32>
    %50 = arith.subf %42, %49 : vector<256x64xf32>
    %51 = arith.mulf %48, %50 : vector<256x64xf32>
    %cst_20 = arith.constant dense<0.000000e+00> : vector<256xf32>
    %52 = vector.multi_reduction <add>, %51, %cst_20 [1] : vector<256x64xf32> to vector<256xf32>
    %53 = vector.shape_cast %52 : vector<256xf32> to vector<256x1xf32>
    %cst_21 = arith.constant 6.400000e+01 : f32
    %54 = vector.broadcast %cst_21 : f32 to vector<256x1xf32>
    %55 = arith.divf %53, %54 : vector<256x1xf32>
    %56 = vector.broadcast %46 : vector<256x1xf32> to vector<256x64xf32>
    %57 = arith.subf %42, %56 : vector<256x64xf32>
    %cst_22 = arith.constant 9.99999974E-6 : f32
    %58 = vector.broadcast %cst_22 : f32 to vector<256x1xf32>
    %59 = arith.addf %55, %58 : vector<256x1xf32>
    %60 = math.rsqrt %59 : vector<256x1xf32>
    %61 = vector.broadcast %60 : vector<256x1xf32> to vector<256x64xf32>
    %62 = arith.mulf %57, %61 : vector<256x64xf32>
    %63 = arith.truncf %62 : vector<256x64xf32> to vector<256x64xbf16>
    %c0_23 = arith.constant 0 : index
    %c0_24 = arith.constant 0 : index
    %64 = vector.load %arg4[%c0_23, %c0_24] : memref<64x16xbf16, #tpu.memory_space<vmem>>, vector<64x16xbf16>
    %cst_25 = arith.constant dense<0.000000e+00> : vector<256x16xf32>
    %65 = tpu.matmul %63, %64, %cst_25 {dimension_numbers = #tpu.dot_dimension_numbers<[1], [0], [0], [1], [0, 0, 1, 1], [], []>} : vector<256x64xbf16>, vector<64x16xbf16>, vector<256x16xf32> -> vector<256x16xf32>
    %c2 = arith.constant 2 : index
    %c0_26 = arith.constant 0 : index
    %66 = vector.load %arg5[%c2, %c0_26] : memref<3x64xf32, #tpu.memory_space<vmem>>, vector<1x16xf32>
    %67 = vector.broadcast %66 : vector<1x16xf32> to vector<256x16xf32>
    %68 = arith.addf %65, %67 : vector<256x16xf32>
    %69 = math.tanh %68 : vector<256x16xf32>
    %c0_27 = arith.constant 0 : index
    %c0_28 = arith.constant 0 : index
    %70 = vector.load %arg6[%c0_27, %c0_28] : memref<256x16xf32, #tpu.memory_space<vmem>>, vector<256x16xf32>
    tpu.vector_store %arg6[%c0_27, %c0_28], %69 {strides = array<i32>} : memref<256x16xf32, #tpu.memory_space<vmem>>, vector<256x16xf32>,
    return
  }
  func.func @transform_0(%arg0: i32) -> (i32, i32) {
    %c0_i32 = arith.constant 0 : i32
    %c0_i32_0 = arith.constant 0 : i32
    return %arg0, %c0_i32 : i32, i32
  }
  func.func @transform_1(%arg0: i32) -> (i32, i32) {
    %c0_i32 = arith.constant 0 : i32
    %c0_i32_0 = arith.constant 0 : i32
    %c0_i32_1 = arith.constant 0 : i32
    return %c0_i32, %c0_i32_0 : i32, i32
  }
  func.func @transform_2(%arg0: i32) -> (i32, i32) {
    %c0_i32 = arith.constant 0 : i32
    %c0_i32_0 = arith.constant 0 : i32
    %c0_i32_1 = arith.constant 0 : i32
    return %c0_i32, %c0_i32_0 : i32, i32
  }
  func.func @transform_3(%arg0: i32) -> (i32, i32) {
    %c0_i32 = arith.constant 0 : i32
    %c0_i32_0 = arith.constant 0 : i32
    %c0_i32_1 = arith.constant 0 : i32
    return %c0_i32, %c0_i32_0 : i32, i32
  }
  func.func @transform_4(%arg0: i32) -> (i32, i32) {
    %c0_i32 = arith.constant 0 : i32
    %c0_i32_0 = arith.constant 0 : i32
    %c0_i32_1 = arith.constant 0 : i32
    return %c0_i32, %c0_i32_0 : i32, i32
  }
  func.func @transform_5(%arg0: i32) -> (i32, i32) {
    %c0_i32 = arith.constant 0 : i32
    %c0_i32_0 = arith.constant 0 : i32
    return %arg0, %c0_i32 : i32, i32
  }
}

</mosaic_0001>

<bundles_post_ra>
// kernel: tpu_custom_call.1
= control target key start
LH: loop header
LB: loop body
LE: loop exit
PB: predicated region body
PF: predicated region fallthrough
CT: control target
= control target key end

     0   :  { %vm82_vm0 = vcmask 130048   ;;  %vm388_vm2 = vcmask 261120   ;;  %s3506_s1 = inlined_call_operand.vmem [shape: bf16[16,32], index: 1, kind: input, shape index: {}]   ;;  %s3507_s0 = inlined_call_operand.vmem [shape: f32[256,16], index: 0, kind: input, shape index: {}]   ;;  %s3508_s4 = inlined_call_operand.vmem [shape: f32[3,64], index: 4, kind: input, shape index: {}]   ;;  %s3509_s2 = inlined_call_operand.vmem [shape: bf16[32,64], index: 2, kind: input, shape index: {}]   ;;  %s3510_s3 = inlined_call_operand.vmem [shape: bf16[64,16], index: 3, kind: input, shape index: {}]   ;;  %s3511_s5 = inlined_call_operand.vmem [shape: f32[256,16], index: 5, kind: output, shape index: {}]  }
   0x1   :  { %v2121_v0 = vld [vmem:[%s3506_s1] sm:$0xff]   ;;  %v22_v2 = vld [vmem:[%s3507_s0 + $0x8] sm:$0xff]  ;;  %v23_v3 = vld [vmem:[%s3507_s0 + $0x10] sm:$0xff] }
   0x2   :  { %v21_v1 = vld [vmem:[%s3507_s0] sm:$0xff]  ;;  %2009 = vmatprep.subr.bf16.mxu0 %v2121_v0  ;;  %v24_v5 = vld [vmem:[%s3507_s0 + $0x18] sm:$0xff]  ;;  %v26_v7 = vld [vmem:[%s3507_s0 + $0x28] sm:$0xff]  ;;  %2119 = vmatprep.subr.bf16.mxu1 %v2121_v0 }
   0x3   :  { %v53_v4 = vpack.c.bf16 %v22_v2, %v21_v1  ;;  %v25_v6 = vld [vmem:[%s3507_s0 + $0x20] sm:$0xff]  ;;  %2010 = vmatpush3.bf16.msra.mxu0 %v2121_v0  ;;  %v54_v8 = vpack.c.bf16 %v24_v5, %v23_v3  ;;  %2120 = vmatpush3.bf16.msra.mxu1 %v2121_v0  ;;  %v27_v10 = vld [vmem:[%s3507_s0 + $0x30] sm:$0xff]  ;;  %v28_v11 = vld [vmem:[%s3507_s0 + $0x38] sm:$0xff] }
   0x4   :  { %v55_v9 = vpack.c.bf16 %v26_v7, %v25_v6  ;;  %v37_v12 = vld [vmem:[%s3507_s0 + $0x80] sm:$0xff]  ;;  %v38_v13 = vld [vmem:[%s3507_s0 + $0x88] sm:$0xff]  ;;  %v39_v15 = vld [vmem:[%s3507_s0 + $0x90] sm:$0xff]  ;;  %v56_v23 = vpack.c.bf16 %v28_v11, %v27_v10 }
   0x5   :  { %2011 = vmatprep.mubr.msk.bf16.mxu0 %vm82_vm0, %v53_v4  ;;  %v61_v14 = vpack.c.bf16 %v38_v13, %v37_v12  ;;  %v40_v16 = vld [vmem:[%s3507_s0 + $0x98] sm:$0xff]  ;;  %v41_v17 = vld [vmem:[%s3507_s0 + $0xa0] sm:$0xff]  ;;  %v30_v19 = vld [vmem:[%s3507_s0 + $0x48] sm:$0xff] }
   0x6   :  { %2012 = vmatmul.mubr.msk.bf16.vlgmr.msra.gmra.mrb[0].mxu0 %vm82_vm0, %v54_v8  ;;  %v29_v18 = vld [vmem:[%s3507_s0 + $0x40] sm:$0xff]  ;;  %v62_v20 = vpack.c.bf16 %v40_v16, %v39_v15  ;;  %v42_v21 = vld [vmem:[%s3507_s0 + $0xa8] sm:$0xff]  ;;  %v43_v25 = vld [vmem:[%s3507_s0 + $0xb0] sm:$0xff] }
   0x7   :  { %2015 = vmatprep.mubr.msk.bf16.mxu0 %vm82_vm0, %v55_v9  ;;  %2027 = vmatprep.mubr.msk.bf16.mxu1 %vm82_vm0, %v61_v14  ;;  %v63_v22 = vpack.c.bf16 %v42_v21, %v41_v17  ;;  %v57_v24 = vpack.c.bf16 %v30_v19, %v29_v18  ;;  %v44_v26 = vld [vmem:[%s3507_s0 + $0xb8] sm:$0xff]  ;;  %v45_v27 = vld [vmem:[%s3507_s0 + $0xc0] sm:$0xff]  ;;  %v46_v28 = vld [vmem:[%s3507_s0 + $0xc8] sm:$0xff] }
   0x8   :  { %2028 = vmatmul.mubr.msk.bf16.vlgmr.msra.gmra.mrb[0].mxu1 %vm82_vm0, %v62_v20  ;;  %v64_v29 = vpack.c.bf16 %v44_v26, %v43_v25  ;;  %v31_v30 = vld [vmem:[%s3507_s0 + $0x50] sm:$0xff]  ;;  %v32_v31 = vld [vmem:[%s3507_s0 + $0x58] sm:$0xff]  ;;  %v65_v32 = vpack.c.bf16 %v46_v28, %v45_v27  ;;  %v33_v33 = vld [vmem:[%s3507_s0 + $0x60] sm:$0xff] }
   0x9   :  { %2031 = vmatprep.mubr.msk.bf16.mxu1 %vm82_vm0, %v63_v22  ;;  %v34_v34 = vld [vmem:[%s3507_s0 + $0x68] sm:$0xff]  ;;  %v58_v35 = vpack.c.bf16 %v32_v31, %v31_v30  ;;  %v47_v37 = vld [vmem:[%s3507_s0 + $0xd0] sm:$0xff]  ;;  %v48_v38 = vld [vmem:[%s3507_s0 + $0xd8] sm:$0xff] }
   0xa   :  { %v59_v36 = vpack.c.bf16 %v34_v34, %v33_v33  ;;  %v49_v39 = vld [vmem:[%s3507_s0 + $0xe0] sm:$0xff]  ;;  %v50_v40 = vld [vmem:[%s3507_s0 + $0xe8] sm:$0xff]  ;;  %v66_v41 = vpack.c.bf16 %v48_v38, %v47_v37  ;;  %v35_v42 = vld [vmem:[%s3507_s0 + $0x70] sm:$0xff] }
   0xb   :  { %v36_v43 = vld [vmem:[%s3507_s0 + $0x78] sm:$0xff]  ;;  %v67_v44 = vpack.c.bf16 %v50_v40, %v49_v39  ;;  %v51_v46 = vld [vmem:[%s3507_s0 + $0xf0] sm:$0xff]  ;;  %v2468_v49 = vld [vmem:[%s3508_s4] ss:$0 sm:$0xff] }
   0xc   :  { %v60_v45 = vpack.c.bf16 %v36_v43, %v35_v42  ;;  %v52_v47 = vld [vmem:[%s3507_s0 + $0xf8] sm:$0xff] }
   0xd   :  { %v68_v48 = vpack.c.bf16 %v52_v47, %v51_v46 }
   0xe   :  { %2016 = vmatmul.mubr.msk.bf16.gmra.mrb[4].mxu0 %vm82_vm0, %v56_v23 }
   0xf   :  { %2019 = vmatprep.mubr.msk.bf16.mxu0 %vm82_vm0, %v57_v24 }
  0x10   :  { %2032 = vmatmul.mubr.msk.bf16.gmra.mrb[4].mxu1 %vm82_vm0, %v64_v29 }
  0x11   :  { %2035 = vmatprep.mubr.msk.bf16.mxu1 %vm82_vm0, %v65_v32 }
  0x16   :  { %2020 = vmatmul.mubr.msk.bf16.gmra.mrb[8].mxu0 %vm82_vm0, %v58_v35 }
  0x17   :  { %2023 = vmatprep.mubr.msk.bf16.mxu0 %vm82_vm0, %v59_v36 }
  0x18   :  { %2036 = vmatmul.mubr.msk.bf16.gmra.mrb[8].mxu1 %vm82_vm0, %v66_v41 }
  0x19   :  { %2039 = vmatprep.mubr.msk.bf16.mxu1 %vm82_vm0, %v67_v44 }
  0x1e   :  { %2024 = vmatmul.mubr.msk.bf16.gmra.mrb[12].mxu0 %vm82_vm0, %v60_v45 }
  0x20   :  { %2040 = vmatmul.mubr.msk.bf16.gmra.mrb[12].mxu1 %vm82_vm0, %v68_v48 }
  0xd9   :  { %v2013_v50 = vpop.f32.mrb[0].mxu0 }
  0xda   :  { %v174_v51 = vadd.f32 %v2013_v50, %v2468_v49  ;;  %v165_v52 = vpop.f32.mrb[1].mxu0 }
  0xdb   :  { %v166_v53 = vadd.f32 %v2468_v49, %v165_v52  ;;  %v2014_v54 = vpop.f32.mrb[2].mxu0  ;;  %v2474_v60 = vpop.f32.mrb[0].mxu1 }
  0xdc   :  { %v326_v55 = vmul.f32 0.2, %v174_v51  ;;  %v177_v56 = vadd.f32 %v2014_v54, %v2468_v49  ;;  %v168_v57 = vpop.f32.mrb[3].mxu0  ;;  %vm294_vm1 = vcmp.ge.f32.partialorder %v174_v51, 0.0  ;;  %v2478_v63 = vpop.f32.mrb[1].mxu1 }
  0xdd   :  { %v324_v58 = vmul.f32 0.2, %v166_v53  ;;  %v169_v59 = vadd.f32 %v2468_v49, %v168_v57  ;;  %vm292_vm3 = vcmp.ge.f32.partialorder %v166_v53, 0.0  ;;  %v2484_v3 = vpop.f32.mrb[2].mxu1 }
  0xde   :  { %v327_v61 = vmul.f32 0.2, %v177_v56  ;;  %v2476_v62 = vsel %vm294_vm1, %v174_v51, %v326_v55  ;;  %vm295_vm4 = vcmp.ge.f32.partialorder %v177_v56, 0.0  ;;  %v2490_v6 = vpop.f32.mrb[3].mxu1 }
  0xdf   :  { %v325_v0 = vmul.f32 0.2, %v169_v59  ;;  %v395_v1 = vsel %vm388_vm2, %v2476_v62, 0.0  ;;  %v2482_v2 = vsel %vm292_vm3, %v166_v53, %v324_v58  ;;  %vm293_vm5 = vcmp.ge.f32.partialorder %v169_v59, 0.0 }
  0xe0   :  { %396 = vadd.xlane.f32.xlu1 %v395_v1  ;;  %v389_v4 = vsel %vm388_vm2, %v2482_v2, 0.0  ;;  %v2488_v5 = vsel %vm295_vm4, %v177_v56, %v327_v61 }
  0xe1   :  { %v2017_v7 = vpop.f32.mrb[4].mxu0  ;;  %390 = vadd.xlane.f32.xlu0 %v389_v4  ;;  %v2492_v8 = vsel %vm293_vm5, %v169_v59, %v325_v0  ;;  %v398_v13 = vsel %vm388_vm2, %v2488_v5, 0.0  ;;  %v230_v59 = vadd.f32 %v2468_v49, %v2478_v63 }
  0xe2   :  { %v190_v9 = vadd.f32 %v2017_v7, %v2468_v49  ;;  %v181_v10 = vpop.f32.mrb[5].mxu0  ;;  %v392_v16 = vsel %vm388_vm2, %v2492_v8, 0.0 }
  0xe3   :  { %v182_v11 = vadd.f32 %v2468_v49, %v181_v10  ;;  %v2018_v12 = vpop.f32.mrb[6].mxu0  ;;  %v2502_v20 = vpop.f32.mrb[4].mxu1  ;;  %v340_v63 = vmul.f32 0.2, %v230_v59  ;;  %vm308_vm4 = vcmp.ge.f32.partialorder %v230_v59, 0.0 }
  0xe4   :  { %v193_v14 = vadd.f32 %v2018_v12, %v2468_v49  ;;  %399 = vadd.xlane.f32.xlu1 %v398_v13  ;;  %v184_v15 = vpop.f32.mrb[7].mxu0  ;;  %v330_v17 = vmul.f32 0.2, %v190_v9  ;;  %vm298_vm7 = vcmp.ge.f32.partialorder %v190_v9, 0.0  ;;  %v2504_v21 = vpop.f32.mrb[5].mxu1 }
  0xe5   :  { %v328_v18 = vmul.f32 0.2, %v182_v11  ;;  %v185_v19 = vadd.f32 %v2468_v49, %v184_v15  ;;  %393 = vadd.xlane.f32.xlu0 %v392_v16  ;;  %vm296_vm6 = vcmp.ge.f32.partialorder %v182_v11, 0.0  ;;  %v2508_v25 = vpop.f32.mrb[6].mxu1  ;;  %v233_v15 = vadd.f32 %v2468_v49, %v2490_v6 }
  0xe6   :  { %v331_v22 = vmul.f32 0.2, %v193_v14  ;;  %vm299_vm9 = vcmp.ge.f32.partialorder %v193_v14, 0.0  ;;  %v2512_v27 = vpop.f32.mrb[7].mxu1  ;;  %v2516_v30 = vsel %vm298_vm7, %v190_v9, %v330_v17  ;;  %v238_v6 = vadd.f32 %v2474_v60, %v2468_v49 }
  0xe7   :  { %v329_v23 = vmul.f32 0.2, %v185_v19  ;;  %v2506_v24 = vsel %vm296_vm6, %v182_v11, %v328_v18  ;;  %vm297_vm8 = vcmp.ge.f32.partialorder %v185_v19, 0.0  ;;  %v407_v39 = vsel %vm388_vm2, %v2516_v30, 0.0 }
  0xe8   :  { %v401_v26 = vsel %vm388_vm2, %v2506_v24, 0.0  ;;  %v2522_v36 = vsel %vm299_vm9, %v193_v14, %v331_v22  ;;  %vm309_vm5 = vcmp.ge.f32.partialorder %v233_v15, 0.0  ;;  %vm310_vm6 = vcmp.ge.f32.partialorder %v238_v6, 0.0 }
  0xe9   :  { %v2021_v28 = vpop.f32.mrb[8].mxu0  ;;  %402 = vadd.xlane.f32.xlu0 %v401_v26  ;;  %v2514_v29 = vsel %vm297_vm8, %v185_v19, %v329_v23  ;;  %v410_v44 = vsel %vm388_vm2, %v2522_v36, 0.0 }
  0xea   :  { %v206_v31 = vadd.f32 %v2021_v28, %v2468_v49  ;;  %v197_v32 = vpop.f32.mrb[9].mxu0  ;;  %v404_v33 = vsel %vm388_vm2, %v2514_v29, 0.0 }
  0xeb   :  { %v198_v34 = vadd.f32 %v2468_v49, %v197_v32  ;;  %v2022_v35 = vpop.f32.mrb[10].mxu0  ;;  %405 = vadd.xlane.f32.xlu1 %v404_v33  ;;  %v2528_v43 = vpop.f32.mrb[8].mxu1  ;;  %v241_v32 = vadd.f32 %v2484_v3, %v2468_v49 }
  0xec   :  { %v209_v37 = vadd.f32 %v2022_v35, %v2468_v49  ;;  %v200_v38 = vpop.f32.mrb[11].mxu0  ;;  %v334_v40 = vmul.f32 0.2, %v206_v31  ;;  %vm302_vm11 = vcmp.ge.f32.partialorder %v206_v31, 0.0  ;;  %v2532_v45 = vpop.f32.mrb[9].mxu1  ;;  %v246_v35 = vadd.f32 %v2468_v49, %v2504_v21 }
  0xed   :  { %v332_v41 = vmul.f32 0.2, %v198_v34  ;;  %v201_v42 = vadd.f32 %v2468_v49, %v200_v38  ;;  %408 = vadd.xlane.f32.xlu0 %v407_v39  ;;  %vm300_vm10 = vcmp.ge.f32.partialorder %v198_v34, 0.0  ;;  %v2536_v50 = vpop.f32.mrb[10].mxu1  ;;  %v2588_v38 = vsel %vm308_vm4, %v230_v59, %v340_v63 }
  0xee   :  { %v335_v46 = vmul.f32 0.2, %v209_v37  ;;  %vm303_vm13 = vcmp.ge.f32.partialorder %v209_v37, 0.0  ;;  %v2540_v52 = vpop.f32.mrb[11].mxu1  ;;  %v2544_v55 = vsel %vm302_vm11, %v206_v31, %v334_v40  ;;  %v342_v39 = vmul.f32 0.2, %v238_v6 }
  0xef   :  { %v333_v47 = vmul.f32 0.2, %v201_v42  ;;  %411 = vadd.xlane.f32.xlu1 %v410_v44  ;;  %v2534_v48 = vsel %vm300_vm10, %v198_v34, %v332_v41  ;;  %vm301_vm12 = vcmp.ge.f32.partialorder %v201_v42, 0.0  ;;  %v419_v9 = vsel %vm388_vm2, %v2544_v55, 0.0 }
  0xf0   :  { %v413_v51 = vsel %vm388_vm2, %v2534_v48, 0.0  ;;  %v2552_v1 = vsel %vm303_vm13, %v209_v37, %v335_v46  ;;  %v341_v34 = vmul.f32 0.2, %v233_v15  ;;  %v437_v40 = vsel %vm388_vm2, %v2588_v38, 0.0 }
  0xf1   :  { %v2025_v53 = vpop.f32.mrb[12].mxu0  ;;  %414 = vadd.xlane.f32.xlu0 %v413_v51  ;;  %v2542_v54 = vsel %vm301_vm12, %v201_v42, %v333_v47  ;;  %v422_v14 = vsel %vm388_vm2, %v2552_v1, 0.0  ;;  %v343_v41 = vmul.f32 0.2, %v241_v32  ;;  %v344_v42 = vmul.f32 0.2, %v246_v35 }
  0xf2   :  { %v222_v56 = vadd.f32 %v2025_v53, %v2468_v49  ;;  %v213_v57 = vpop.f32.mrb[13].mxu0  ;;  %v416_v58 = vsel %vm388_vm2, %v2542_v54, 0.0  ;;  %v249_v21 = vadd.f32 %v2468_v49, %v2512_v27  ;;  %v2598_v44 = vsel %vm309_vm5, %v233_v15, %v341_v34 }
  0xf3   :  { %v214_v61 = vadd.f32 %v2468_v49, %v213_v57  ;;  %v2026_v0 = vpop.f32.mrb[14].mxu0  ;;  %417 = vadd.xlane.f32.xlu1 %v416_v58  ;;  %v2558_v13 = vpop.f32.mrb[12].mxu1  ;;  %vm311_vm7 = vcmp.ge.f32.partialorder %v241_v32, 0.0  ;;  %vm312_vm8 = vcmp.ge.f32.partialorder %v246_v35, 0.0  ;;  %v254_v46 = vadd.f32 %v2502_v20, %v2468_v49 }
  0xf4   :  { %v225_v4 = vadd.f32 %v2026_v0, %v2468_v49  ;;  %v216_v7 = vpop.f32.mrb[15].mxu0  ;;  %v338_v10 = vmul.f32 0.2, %v222_v56  ;;  %vm306_vm15 = vcmp.ge.f32.partialorder %v222_v56, 0.0  ;;  %v2564_v16 = vpop.f32.mrb[13].mxu1  ;;  %v2602_v47 = vsel %vm310_vm6, %v238_v6, %v342_v39 }
  0xf5   :  { %v336_v11 = vmul.f32 0.2, %v214_v61  ;;  %v217_v12 = vadd.f32 %v2468_v49, %v216_v7  ;;  %420 = vadd.xlane.f32.xlu0 %v419_v9  ;;  %vm304_vm14 = vcmp.ge.f32.partialorder %v214_v61, 0.0  ;;  %v2568_v22 = vpop.f32.mrb[14].mxu1  ;;  %v257_v51 = vadd.f32 %v2508_v25, %v2468_v49 }
  0xf6   :  { %v339_v17 = vmul.f32 0.2, %v225_v4  ;;  %vm307_vm3 = vcmp.ge.f32.partialorder %v225_v4, 0.0  ;;  %v2572_v26 = vpop.f32.mrb[15].mxu1  ;;  %v2578_v31 = vsel %vm306_vm15, %v222_v56, %v338_v10  ;;  %v440_v53 = vsel %vm388_vm2, %v2598_v44, 0.0 }
  0xf7   :  { %v337_v18 = vmul.f32 0.2, %v217_v12  ;;  %423 = vadd.xlane.f32.xlu1 %v422_v14  ;;  %v2566_v19 = vsel %vm304_vm14, %v214_v61, %v336_v11  ;;  %vm305_vm1 = vcmp.ge.f32.partialorder %v217_v12, 0.0  ;;  %v431_v60 = vsel %vm388_vm2, %v2578_v31, 0.0 }
  0xf8   :  { %v425_v23 = vsel %vm388_vm2, %v2566_v19, 0.0  ;;  %v2586_v37 = vsel %vm307_vm3, %v225_v4, %v339_v17  ;;  %v345_v56 = vmul.f32 0.2, %v249_v21  ;;  %v262_v27 = vadd.f32 %v2468_v49, %v2532_v45 }
  0xf9   :  { %426 = vadd.xlane.f32.xlu0 %v425_v23  ;;  %v2576_v28 = vsel %vm305_vm1, %v217_v12, %v337_v18  ;;  %v434_v3 = vsel %vm388_vm2, %v2586_v37, 0.0  ;;  %v2610_v57 = vsel %vm311_vm7, %v241_v32, %v343_v41  ;;  %v2612_v58 = vsel %vm312_vm8, %v246_v35, %v344_v42 }
  0xfa   :  { %v428_v33 = vsel %vm388_vm2, %v2576_v28, 0.0  ;;  %v443_v20 = vsel %vm388_vm2, %v2602_v47, 0.0  ;;  %vm313_vm9 = vcmp.ge.f32.partialorder %v249_v21, 0.0  ;;  %v346_v59 = vmul.f32 0.2, %v254_v46 }
  0xfb   :  { %429 = vadd.xlane.f32.xlu1 %v428_v33  ;;  %v446_v25 = vsel %vm388_vm2, %v2610_v57, 0.0  ;;  %v449_v61 = vsel %vm388_vm2, %v2612_v58, 0.0  ;;  %vm314_vm10 = vcmp.ge.f32.partialorder %v254_v46, 0.0  ;;  %v347_v0 = vmul.f32 0.2, %v257_v51 }
  0xfc   :  { %v348_v4 = vmul.f32 0.2, %v262_v27  ;;  %v265_v45 = vadd.f32 %v2468_v49, %v2540_v52  ;;  %v2622_v7 = vsel %vm313_vm9, %v249_v21, %v345_v56  ;;  %vm315_vm11 = vcmp.ge.f32.partialorder %v257_v51, 0.0 }
  0xfd   :  { %432 = vadd.xlane.f32.xlu0 %v431_v60  ;;  %vm316_vm12 = vcmp.ge.f32.partialorder %v262_v27, 0.0  ;;  %v270_v9 = vadd.f32 %v2528_v43, %v2468_v49  ;;  %v2626_v10 = vsel %vm314_vm10, %v254_v46, %v346_v59  ;;  %v273_v11 = vadd.f32 %v2536_v50, %v2468_v49 }
  0xfe   :  { %v452_v12 = vsel %vm388_vm2, %v2622_v7, 0.0  ;;  %v349_v63 = vmul.f32 0.2, %v265_v45  ;;  %v278_v52 = vadd.f32 %v2468_v49, %v2564_v16  ;;  %v2634_v14 = vsel %vm315_vm11, %v257_v51, %v347_v0 }
  0xff   :  { %435 = vadd.xlane.f32.xlu1 %v434_v3  ;;  %v2636_v15 = vsel %vm316_vm12, %v262_v27, %v348_v4  ;;  %v455_v43 = vsel %vm388_vm2, %v2626_v10, 0.0  ;;  %vm317_vm13 = vcmp.ge.f32.partialorder %v265_v45, 0.0  ;;  %v350_v17 = vmul.f32 0.2, %v270_v9  ;;  %v2122_v27 = vld [vmem:[%s3509_s2] sm:$0xff]  }
 0x100   :  { %v458_v50 = vsel %vm388_vm2, %v2634_v14, 0.0  ;;  %v461_v18 = vsel %vm388_vm2, %v2636_v15, 0.0  ;;  %vm318_vm14 = vcmp.ge.f32.partialorder %v270_v9, 0.0  ;;  %v351_v23 = vmul.f32 0.2, %v273_v11  ;;  %2043 = vmatprep.subr.bf16.mxu1 %v2122_v27 }
 0x101   :  { %438 = vadd.xlane.f32.xlu0 %v437_v40  ;;  %v352_v6 = vmul.f32 0.2, %v278_v52  ;;  %v281_v16 = vadd.f32 %v2468_v49, %v2572_v26  ;;  %v2646_v32 = vsel %vm317_vm13, %v265_v45, %v349_v63  ;;  %vm319_vm15 = vcmp.ge.f32.partialorder %v273_v11, 0.0  ;;  %2044 = vmatpush3.bf16.msra.mxu1 %v2122_v27 }
 0x102   :  { %vm320_vm1 = vcmp.ge.f32.partialorder %v278_v52, 0.0  ;;  %v286_v33 = vadd.f32 %v2558_v13, %v2468_v49  ;;  %v2650_v34 = vsel %vm318_vm14, %v270_v9, %v350_v17  ;;  %v464_v35 = vsel %vm388_vm2, %v2646_v32, 0.0 }
 0x103   :  { %441 = vadd.xlane.f32.xlu1 %v440_v53  ;;  %v289_v60 = vadd.f32 %v2568_v22, %v2468_v49  ;;  %v353_v39 = vmul.f32 0.2, %v281_v16  ;;  %v2656_v3 = vsel %vm319_vm15, %v273_v11, %v351_v23  ;;  %v2658_v26 = vsel %vm320_vm1, %v278_v52, %v352_v6 }
 0x104   :  { %v467_v40 = vsel %vm388_vm2, %v2650_v34, 0.0  ;;  %vm321_vm3 = vcmp.ge.f32.partialorder %v281_v16, 0.0  ;;  %v354_v13 = vmul.f32 0.2, %v286_v33  ;;  %v470_v41 = vsel %vm388_vm2, %v2656_v3, 0.0 }
 0x105   :  { %444 = vadd.xlane.f32.xlu0 %v443_v20  ;;  %v473_v42 = vsel %vm388_vm2, %v2658_v26, 0.0  ;;  %vm322_vm4 = vcmp.ge.f32.partialorder %v286_v33, 0.0  ;;  %v355_v49 = vmul.f32 0.2, %v289_v60  ;;  %v2666_v22 = vsel %vm321_vm3, %v281_v16, %v353_v39 }
 0x106   :  { %vm323_vm5 = vcmp.ge.f32.partialorder %v289_v60, 0.0  ;;  %v2668_v21 = vsel %vm322_vm4, %v286_v33, %v354_v13  ;;  %v476_v46 = vsel %vm388_vm2, %v2666_v22, 0.0  ;;  %vm1148_vm6 = vcmask 523264  }
 0x107   :  { %447 = vadd.xlane.f32.xlu1 %v446_v25  ;;  %v2672_v51 = vsel %vm323_vm5, %v289_v60, %v355_v49  ;;  %v479_v53 = vsel %vm388_vm2, %v2668_v21, 0.0 }
 0x108   :  { %v482_v56 = vsel %vm388_vm2, %v2672_v51, 0.0 }
 0x109   :  { %450 = vadd.xlane.f32.xlu0 %v449_v61 }
 0x10b   :  { %453 = vadd.xlane.f32.xlu1 %v452_v12 }
 0x10d   :  { %456 = vadd.xlane.f32.xlu0 %v455_v43 }
 0x10f   :  { %459 = vadd.xlane.f32.xlu1 %v458_v50 }
 0x111   :  { %462 = vadd.xlane.f32.xlu0 %v461_v18 }
 0x113   :  { %465 = vadd.xlane.f32.xlu1 %v464_v35 }
 0x115   :  { %468 = vadd.xlane.f32.xlu0 %v467_v40 }
 0x117   :  { %471 = vadd.xlane.f32.xlu1 %v470_v41 }
 0x119   :  { %474 = vadd.xlane.f32.xlu0 %v473_v42 }
 0x11b   :  { %477 = vadd.xlane.f32.xlu1 %v476_v46 }
 0x11d   :  { %480 = vadd.xlane.f32.xlu0 %v479_v53 }
 0x11f   :  { %483 = vadd.xlane.f32.xlu1 %v482_v56 }
 0x16d   :  { %v397_v20 = vpop.xlane.xlu1 %396 }
 0x16e   :  { %v488_v59 = vmul.f32 0.03125, %v397_v20  ;;  %v391_v25 = vpop.xlane.xlu0 %390 }
 0x16f   :  { %v486_v61 = vmul.f32 0.03125, %v391_v25 }
 0x170   :  { %v2682_v0 = vsub.f32 %v2476_v62, %v488_v59 }
 0x171   :  { %v2685_v4 = vsub.f32 %v2482_v2, %v486_v61  ;;  %v400_v45 = vpop.xlane.xlu1 %399 }
 0x172   :  { %v489_v9 = vmul.f32 0.03125, %v400_v45  ;;  %v394_v11 = vpop.xlane.xlu0 %393  ;;  %v552_v62 = vmul.f32 %v2682_v0, %v2682_v0 }
 0x173   :  { %v487_v12 = vmul.f32 0.03125, %v394_v11  ;;  %v550_v63 = vmul.f32 %v2685_v4, %v2685_v4 }
 0x174   :  { %v2690_v52 = vsub.f32 %v2488_v5, %v489_v9  ;;  %v588_v16 = vsel %vm388_vm2, %v552_v62, 0.0 }
 0x175   :  { %v2693_v43 = vsub.f32 %v2492_v8, %v487_v12  ;;  %v582_v17 = vsel %vm388_vm2, %v550_v63, 0.0 }
 0x176   :  { %583 = vadd.xlane.f32.xlu0 %v582_v17  ;;  %v403_v2 = vpop.xlane.xlu0 %402  ;;  %v553_v6 = vmul.f32 %v2690_v52, %v2690_v52 }
 0x177   :  { %v490_v50 = vmul.f32 0.03125, %v403_v2  ;;  %v551_v18 = vmul.f32 %v2693_v43, %v2693_v43 }
 0x178   :  { %v406_v23 = vpop.xlane.xlu1 %405  ;;  %v591_v41 = vsel %vm388_vm2, %v553_v6, 0.0 }
 0x179   :  { %v2703_v5 = vsub.f32 %v2506_v24, %v490_v50  ;;  %v491_v8 = vmul.f32 0.03125, %v406_v23  ;;  %v585_v33 = vsel %vm388_vm2, %v551_v18, 0.0 }
 0x17a   :  { %589 = vadd.xlane.f32.xlu0 %v588_v16  ;;  %586 = vadd.xlane.f32.xlu1 %v585_v33  ;;  %v409_v35 = vpop.xlane.xlu0 %408 }
 0x17b   :  { %v2708_v60 = vsub.f32 %v2514_v29, %v491_v8  ;;  %v492_v39 = vmul.f32 0.03125, %v409_v35  ;;  %v554_v40 = vmul.f32 %v2703_v5, %v2703_v5 }
 0x17c   :  { %v412_v13 = vpop.xlane.xlu1 %411 }
 0x17d   :  { %v2714_v24 = vsub.f32 %v2516_v30, %v492_v39  ;;  %v493_v42 = vmul.f32 0.03125, %v412_v13  ;;  %v594_v49 = vsel %vm388_vm2, %v554_v40, 0.0  ;;  %v555_v46 = vmul.f32 %v2708_v60, %v2708_v60 }
 0x17e   :  { %592 = vadd.xlane.f32.xlu1 %v591_v41  ;;  %595 = vadd.xlane.f32.xlu0 %v594_v49  ;;  %v415_v29 = vpop.xlane.xlu0 %414 }
 0x17f   :  { %v2720_v53 = vsub.f32 %v2522_v36, %v493_v42  ;;  %v494_v56 = vmul.f32 0.03125, %v415_v29  ;;  %v556_v27 = vmul.f32 %v2714_v24, %v2714_v24  ;;  %v597_v30 = vsel %vm388_vm2, %v555_v46, 0.0 }
 0x180   :  { %v418_v20 = vpop.xlane.xlu1 %417 }
 0x181   :  { %v2726_v59 = vsub.f32 %v2534_v48, %v494_v56  ;;  %v495_v25 = vmul.f32 0.03125, %v418_v20  ;;  %v600_v61 = vsel %vm388_vm2, %v556_v27, 0.0  ;;  %v557_v45 = vmul.f32 %v2720_v53, %v2720_v53 }
 0x182   :  { %598 = vadd.xlane.f32.xlu1 %v597_v30  ;;  %601 = vadd.xlane.f32.xlu0 %v600_v61  ;;  %v421_v36 = vpop.xlane.xlu0 %420 }
 0x183   :  { %v2732_v9 = vsub.f32 %v2542_v54, %v495_v25  ;;  %v496_v11 = vmul.f32 0.03125, %v421_v36  ;;  %v558_v12 = vmul.f32 %v2726_v59, %v2726_v59  ;;  %v603_v48 = vsel %vm388_vm2, %v557_v45, 0.0 }
 0x184   :  { %v424_v63 = vpop.xlane.xlu1 %423 }
 0x185   :  { %v2738_v17 = vsub.f32 %v2544_v55, %v496_v11  ;;  %v497_v62 = vmul.f32 0.03125, %v424_v63  ;;  %v606_v2 = vsel %vm388_vm2, %v558_v12, 0.0  ;;  %v559_v50 = vmul.f32 %v2732_v9, %v2732_v9 }
 0x186   :  { %604 = vadd.xlane.f32.xlu1 %v603_v48  ;;  %607 = vadd.xlane.f32.xlu0 %v606_v2  ;;  %v427_v54 = vpop.xlane.xlu0 %426 }
 0x187   :  { %v2744_v18 = vsub.f32 %v2552_v1, %v497_v62  ;;  %v498_v23 = vmul.f32 0.03125, %v427_v54  ;;  %v560_v6 = vmul.f32 %v2738_v17, %v2738_v17  ;;  %v609_v55 = vsel %vm388_vm2, %v559_v50, 0.0 }
 0x188   :  { %v430_v8 = vpop.xlane.xlu1 %429 }
 0x189   :  { %v2750_v16 = vsub.f32 %v2566_v19, %v498_v23  ;;  %v499_v33 = vmul.f32 0.03125, %v430_v8  ;;  %v612_v35 = vsel %vm388_vm2, %v560_v6, 0.0  ;;  %v561_v39 = vmul.f32 %v2744_v18, %v2744_v18 }
 0x18a   :  { %610 = vadd.xlane.f32.xlu1 %v609_v55  ;;  %613 = vadd.xlane.f32.xlu0 %v612_v35  ;;  %v433_v1 = vpop.xlane.xlu0 %432 }
 0x18b   :  { %v2756_v40 = vsub.f32 %v2576_v28, %v499_v33  ;;  %v500_v13 = vmul.f32 0.03125, %v433_v1  ;;  %v562_v41 = vmul.f32 %v2750_v16, %v2750_v16  ;;  %v615_v19 = vsel %vm388_vm2, %v561_v39, 0.0 }
 0x18c   :  { %v436_v42 = vpop.xlane.xlu1 %435 }
 0x18d   :  { %v2762_v49 = vsub.f32 %v2578_v31, %v500_v13  ;;  %v501_v46 = vmul.f32 0.03125, %v436_v42  ;;  %v618_v29 = vsel %vm388_vm2, %v562_v41, 0.0  ;;  %v563_v56 = vmul.f32 %v2756_v40, %v2756_v40  ;;  %v2123_v41 = vld [vmem:[%s3509_s2 + $0x8] sm:$0xff]  }
 0x18e   :  { %616 = vadd.xlane.f32.xlu1 %v615_v19  ;;  %619 = vadd.xlane.f32.xlu0 %v618_v29  ;;  %v439_v28 = vpop.xlane.xlu0 %438 }
 0x18f   :  { %v2768_v27 = vsub.f32 %v2586_v37, %v501_v46  ;;  %v502_v20 = vmul.f32 0.03125, %v439_v28  ;;  %v564_v30 = vmul.f32 %v2762_v49, %v2762_v49  ;;  %v621_v31 = vsel %vm388_vm2, %v563_v56, 0.0  ;;  %2045 = vmatprep.subr.bf16.mxu1 %v2123_v41 }
 0x190   :  { %v442_v25 = vpop.xlane.xlu1 %441  ;;  %2046 = vmatpush3.bf16.msra.mxu1 %v2123_v41 }
 0x191   :  { %v2774_v61 = vsub.f32 %v2588_v38, %v502_v20  ;;  %v503_v45 = vmul.f32 0.03125, %v442_v25  ;;  %v624_v36 = vsel %vm388_vm2, %v564_v30, 0.0  ;;  %v565_v11 = vmul.f32 %v2768_v27, %v2768_v27 }
 0x192   :  { %622 = vadd.xlane.f32.xlu1 %v621_v31  ;;  %625 = vadd.xlane.f32.xlu0 %v624_v36  ;;  %v445_v37 = vpop.xlane.xlu0 %444 }
 0x193   :  { %v2780_v12 = vsub.f32 %v2598_v44, %v503_v45  ;;  %v504_v63 = vmul.f32 0.03125, %v445_v37  ;;  %v566_v48 = vmul.f32 %v2774_v61, %v2774_v61  ;;  %v627_v38 = vsel %vm388_vm2, %v565_v11, 0.0 }
 0x194   :  { %v448_v62 = vpop.xlane.xlu1 %447 }
 0x195   :  { %v2786_v2 = vsub.f32 %v2602_v47, %v504_v63  ;;  %v505_v50 = vmul.f32 0.03125, %v448_v62  ;;  %v630_v54 = vsel %vm388_vm2, %v566_v48, 0.0  ;;  %v567_v23 = vmul.f32 %v2780_v12, %v2780_v12 }
 0x196   :  { %628 = vadd.xlane.f32.xlu1 %v627_v38  ;;  %631 = vadd.xlane.f32.xlu0 %v630_v54  ;;  %v451_v44 = vpop.xlane.xlu0 %450 }
 0x197   :  { %v2792_v6 = vsub.f32 %v2610_v57, %v505_v50  ;;  %v506_v8 = vmul.f32 0.03125, %v451_v44  ;;  %v568_v55 = vmul.f32 %v2786_v2, %v2786_v2  ;;  %v633_v47 = vsel %vm388_vm2, %v567_v23, 0.0 }
 0x198   :  { %v454_v33 = vpop.xlane.xlu1 %453 }
 0x199   :  { %v2798_v35 = vsub.f32 %v2612_v58, %v506_v8  ;;  %v507_v39 = vmul.f32 0.03125, %v454_v33  ;;  %v636_v1 = vsel %vm388_vm2, %v568_v55, 0.0  ;;  %v569_v13 = vmul.f32 %v2792_v6, %v2792_v6 }
 0x19a   :  { %634 = vadd.xlane.f32.xlu1 %v633_v47  ;;  %637 = vadd.xlane.f32.xlu0 %v636_v1  ;;  %v457_v57 = vpop.xlane.xlu0 %456 }
 0x19b   :  { %v2807_v42 = vsub.f32 %v2622_v7, %v507_v39  ;;  %v508_v19 = vmul.f32 0.03125, %v457_v57  ;;  %v570_v58 = vmul.f32 %v2798_v35, %v2798_v35  ;;  %v639_v29 = vsel %vm388_vm2, %v569_v13, 0.0 }
 0x19c   :  { %v460_v46 = vpop.xlane.xlu1 %459 }
 0x19d   :  { %v2813_v56 = vsub.f32 %v2626_v10, %v508_v19  ;;  %v509_v28 = vmul.f32 0.03125, %v460_v46  ;;  %v642_v20 = vsel %vm388_vm2, %v570_v58, 0.0  ;;  %v571_v30 = vmul.f32 %v2807_v42, %v2807_v42 }
 0x19e   :  { %640 = vadd.xlane.f32.xlu1 %v639_v29  ;;  %643 = vadd.xlane.f32.xlu0 %v642_v20  ;;  %v463_v7 = vpop.xlane.xlu0 %462 }
 0x19f   :  { %v2819_v25 = vsub.f32 %v2634_v14, %v509_v28  ;;  %v510_v31 = vmul.f32 0.03125, %v463_v7  ;;  %v572_v45 = vmul.f32 %v2813_v56, %v2813_v56  ;;  %v645_v10 = vsel %vm388_vm2, %v571_v30, 0.0 }
 0x1a0   :  { %v466_v36 = vpop.xlane.xlu1 %465 }
 0x1a1   :  { %v2825_v11 = vsub.f32 %v2636_v15, %v510_v31  ;;  %v511_v37 = vmul.f32 0.03125, %v466_v36  ;;  %v648_v63 = vsel %vm388_vm2, %v572_v45, 0.0  ;;  %v573_v48 = vmul.f32 %v2819_v25, %v2819_v25 }
 0x1a2   :  { %646 = vadd.xlane.f32.xlu1 %v645_v10  ;;  %649 = vadd.xlane.f32.xlu0 %v648_v63  ;;  %v469_v14 = vpop.xlane.xlu0 %468 }
 0x1a3   :  { %v2831_v62 = vsub.f32 %v2646_v32, %v511_v37  ;;  %v512_v38 = vmul.f32 0.03125, %v469_v14  ;;  %v574_v50 = vmul.f32 %v2825_v11, %v2825_v11  ;;  %v651_v15 = vsel %vm388_vm2, %v573_v48, 0.0 }
 0x1a4   :  { %v472_v54 = vpop.xlane.xlu1 %471 }
 0x1a5   :  { %v2837_v23 = vsub.f32 %v2650_v34, %v512_v38  ;;  %v513_v44 = vmul.f32 0.03125, %v472_v54  ;;  %v654_v8 = vsel %vm388_vm2, %v574_v50, 0.0  ;;  %v575_v55 = vmul.f32 %v2831_v62, %v2831_v62 }
 0x1a6   :  { %652 = vadd.xlane.f32.xlu1 %v651_v15  ;;  %655 = vadd.xlane.f32.xlu0 %v654_v8  ;;  %v475_v32 = vpop.xlane.xlu0 %474 }
 0x1a7   :  { %v2843_v33 = vsub.f32 %v2656_v3, %v513_v44  ;;  %v514_v47 = vmul.f32 0.03125, %v475_v32  ;;  %v576_v39 = vmul.f32 %v2837_v23, %v2837_v23  ;;  %v657_v34 = vsel %vm388_vm2, %v575_v55, 0.0 }
 0x1a8   :  { %v478_v1 = vpop.xlane.xlu1 %477 }
 0x1a9   :  { %v2849_v13 = vsub.f32 %v2658_v26, %v514_v47  ;;  %v515_v57 = vmul.f32 0.03125, %v478_v1  ;;  %v660_v41 = vsel %vm388_vm2, %v576_v39, 0.0  ;;  %v577_v19 = vmul.f32 %v2843_v33, %v2843_v33 }
 0x1aa   :  { %658 = vadd.xlane.f32.xlu1 %v657_v34  ;;  %661 = vadd.xlane.f32.xlu0 %v660_v41  ;;  %v481_v3 = vpop.xlane.xlu0 %480 }
 0x1ab   :  { %v2855_v58 = vsub.f32 %v2666_v22, %v515_v57  ;;  %v516_v46 = vmul.f32 0.03125, %v481_v3  ;;  %v578_v29 = vmul.f32 %v2849_v13, %v2849_v13  ;;  %v663_v26 = vsel %vm388_vm2, %v577_v19, 0.0 }
 0x1ac   :  { %v484_v28 = vpop.xlane.xlu1 %483 }
 0x1ad   :  { %v2861_v20 = vsub.f32 %v2668_v21, %v516_v46  ;;  %v517_v30 = vmul.f32 0.03125, %v484_v28  ;;  %v666_v7 = vsel %vm388_vm2, %v578_v29, 0.0  ;;  %v579_v31 = vmul.f32 %v2855_v58, %v2855_v58 }
 0x1ae   :  { %664 = vadd.xlane.f32.xlu1 %v663_v26  ;;  %667 = vadd.xlane.f32.xlu0 %v666_v7 }
 0x1af   :  { %v2867_v22 = vsub.f32 %v2672_v51, %v517_v30  ;;  %v580_v45 = vmul.f32 %v2861_v20, %v2861_v20  ;;  %v669_v36 = vsel %vm388_vm2, %v579_v31, 0.0 }
 0x1b1   :  { %v672_v10 = vsel %vm388_vm2, %v580_v45, 0.0  ;;  %v581_v21 = vmul.f32 %v2867_v22, %v2867_v22 }
 0x1b2   :  { %670 = vadd.xlane.f32.xlu1 %v669_v36  ;;  %673 = vadd.xlane.f32.xlu0 %v672_v10 }
 0x1b3   :  { %v675_v37 = vsel %vm388_vm2, %v581_v21, 0.0 }
 0x1b6   :  { %676 = vadd.xlane.f32.xlu1 %v675_v37 }
 0x203   :  { %v584_v63 = vpop.xlane.xlu0 %583 }
 0x204   :  { %v678_v48 = vmul.f32 0.03125, %v584_v63 }
 0x206   :  { %v710_v14 = vadd.f32 1e-05, %v678_v48 }
 0x207   :  { %v587_v51 = vpop.xlane.xlu1 %586  ;;  %v590_v38 = vpop.xlane.xlu0 %589 }
 0x208   :  { %v679_v50 = vmul.f32 0.03125, %v587_v51  ;;  %v680_v54 = vmul.f32 0.03125, %v590_v38  ;;  %2128 = vrsqrt.f32 %v710_v14 }
 0x20a   :  { %v711_v15 = vadd.f32 1e-05, %v679_v50  ;;  %v712_v44 = vadd.f32 1e-05, %v680_v54 }
 0x20b   :  { %v593_v8 = vpop.xlane.xlu1 %592  ;;  %v596_v55 = vpop.xlane.xlu0 %595 }
 0x20c   :  { %2130 = vrsqrt.f32 %v711_v15  ;;  %v681_v32 = vmul.f32 0.03125, %v593_v8  ;;  %v682_v47 = vmul.f32 0.03125, %v596_v55 }
 0x20d   :  { %2132 = vrsqrt.f32 %v712_v44 }
 0x20e   :  { %v713_v39 = vadd.f32 1e-05, %v681_v32  ;;  %v714_v1 = vadd.f32 1e-05, %v682_v47 }
 0x20f   :  { %v599_v34 = vpop.xlane.xlu1 %598  ;;  %v602_v57 = vpop.xlane.xlu0 %601 }
 0x210   :  { %2134 = vrsqrt.f32 %v713_v39  ;;  %v683_v41 = vmul.f32 0.03125, %v599_v34  ;;  %v684_v19 = vmul.f32 0.03125, %v602_v57 }
 0x211   :  { %2136 = vrsqrt.f32 %v714_v1 }
 0x212   :  { %v715_v3 = vadd.f32 1e-05, %v683_v41  ;;  %v716_v46 = vadd.f32 1e-05, %v684_v19  ;;  %v2129_v26 = vpop.eup %2128 }
 0x213   :  { %v605_v29 = vpop.xlane.xlu1 %604  ;;  %v608_v28 = vpop.xlane.xlu0 %607  ;;  %v774_v37 = vmul.f32 %v2129_v26, %v2685_v4 }
 0x214   :  { %2138 = vrsqrt.f32 %v715_v3  ;;  %v685_v30 = vmul.f32 0.03125, %v605_v29  ;;  %v686_v7 = vmul.f32 0.03125, %v608_v28 }
 0x215   :  { %2140 = vrsqrt.f32 %v716_v46 }
 0x216   :  { %v2131_v31 = vpop.eup %2130  ;;  %v717_v45 = vadd.f32 1e-05, %v685_v30  ;;  %v718_v36 = vadd.f32 1e-05, %v686_v7 }
 0x217   :  { %v611_v10 = vpop.xlane.xlu1 %610  ;;  %v614_v21 = vpop.xlane.xlu0 %613  ;;  %v775_v63 = vmul.f32 %v2131_v31, %v2693_v43 }
 0x218   :  { %v2133_v48 = vpop.eup %2132  ;;  %2142 = vrsqrt.f32 %v717_v45  ;;  %v687_v14 = vmul.f32 0.03125, %v611_v10  ;;  %v688_v51 = vmul.f32 0.03125, %v614_v21 }
 0x219   :  { %v806_v38 = vpack.c.bf16 %v775_v63, %v774_v37  ;;  %2144 = vrsqrt.f32 %v718_v36  ;;  %v776_v44 = vmul.f32 %v2133_v48, %v2682_v0 }
 0x21a   :  { %v2135_v50 = vpop.eup %2134  ;;  %v719_v54 = vadd.f32 1e-05, %v687_v14  ;;  %v720_v15 = vadd.f32 1e-05, %v688_v51 }
 0x21b   :  { %v777_v8 = vmul.f32 %v2135_v50, %v2690_v52  ;;  %v617_v55 = vpop.xlane.xlu1 %616  ;;  %2047 = vmatprep.mubr.msk.bf16.mxu1 %vm388_vm2, %v806_v38  ;;  %v620_v32 = vpop.xlane.xlu0 %619 }
 0x21c   :  { %v2137_v4 = vpop.eup %2136  ;;  %2146 = vrsqrt.f32 %v719_v54  ;;  %v689_v43 = vmul.f32 0.03125, %v617_v55  ;;  %v690_v47 = vmul.f32 0.03125, %v620_v32 }
 0x21d   :  { %v807_v39 = vpack.c.bf16 %v777_v8, %v776_v44  ;;  %2148 = vrsqrt.f32 %v720_v15  ;;  %v778_v0 = vmul.f32 %v2137_v4, %v2703_v5 }
 0x21e   :  { %v2139_v1 = vpop.eup %2138  ;;  %v721_v34 = vadd.f32 1e-05, %v689_v43  ;;  %v722_v57 = vadd.f32 1e-05, %v690_v47 }
 0x21f   :  { %v623_v41 = vpop.xlane.xlu1 %622  ;;  %2048 = vmatmul.mubr.msk.bf16.vlgmr.msra.gmra.mrb[16].mxu1 %vm388_vm2, %v807_v39  ;;  %v626_v19 = vpop.xlane.xlu0 %625  ;;  %v779_v52 = vmul.f32 %v2139_v1, %v2708_v60 }
 0x220   :  { %v2141_v3 = vpop.eup %2140  ;;  %2150 = vrsqrt.f32 %v721_v34  ;;  %v691_v46 = vmul.f32 0.03125, %v623_v41  ;;  %v692_v29 = vmul.f32 0.03125, %v626_v19 }
 0x221   :  { %v808_v28 = vpack.c.bf16 %v779_v52, %v778_v0  ;;  %2152 = vrsqrt.f32 %v722_v57  ;;  %v780_v36 = vmul.f32 %v2141_v3, %v2714_v24 }
 0x222   :  { %v2143_v26 = vpop.eup %2142  ;;  %v723_v30 = vadd.f32 1e-05, %v691_v46  ;;  %v724_v7 = vadd.f32 1e-05, %v692_v29 }
 0x223   :  { %v629_v31 = vpop.xlane.xlu1 %628  ;;  %2051 = vmatprep.mubr.msk.bf16.mxu1 %vm388_vm2, %v808_v28  ;;  %v632_v45 = vpop.xlane.xlu0 %631  ;;  %v781_v10 = vmul.f32 %v2143_v26, %v2720_v53 }
 0x224   :  { %v2145_v5 = vpop.eup %2144  ;;  %2154 = vrsqrt.f32 %v723_v30  ;;  %v693_v60 = vmul.f32 0.03125, %v629_v31  ;;  %v694_v21 = vmul.f32 0.03125, %v632_v45 }
 0x225   :  { %v809_v37 = vpack.c.bf16 %v781_v10, %v780_v36  ;;  %2156 = vrsqrt.f32 %v724_v7  ;;  %v782_v50 = vmul.f32 %v2145_v5, %v2726_v59 }
 0x226   :  { %v2147_v63 = vpop.eup %2146  ;;  %v725_v48 = vadd.f32 1e-05, %v693_v60  ;;  %v726_v14 = vadd.f32 1e-05, %v694_v21 }
 0x227   :  { %v635_v51 = vpop.xlane.xlu1 %634  ;;  %2052 = vmatmul.mubr.msk.bf16.gmra.mrb[20].mxu1 %vm388_vm2, %v809_v37  ;;  %v638_v38 = vpop.xlane.xlu0 %637  ;;  %v783_v54 = vmul.f32 %v2147_v63, %v2732_v9 }
 0x228   :  { %v2149_v24 = vpop.eup %2148  ;;  %2158 = vrsqrt.f32 %v725_v48  ;;  %v695_v53 = vmul.f32 0.03125, %v635_v51  ;;  %v696_v15 = vmul.f32 0.03125, %v638_v38 }
 0x229   :  { %v810_v44 = vpack.c.bf16 %v783_v54, %v782_v50  ;;  %2160 = vrsqrt.f32 %v726_v14  ;;  %v784_v47 = vmul.f32 %v2149_v24, %v2738_v17 }
 0x22a   :  { %v2151_v8 = vpop.eup %2150  ;;  %v727_v55 = vadd.f32 1e-05, %v695_v53  ;;  %v728_v32 = vadd.f32 1e-05, %v696_v15 }
 0x22b   :  { %v641_v4 = vpop.xlane.xlu1 %640  ;;  %2055 = vmatprep.mubr.msk.bf16.mxu1 %vm388_vm2, %v810_v44  ;;  %v644_v43 = vpop.xlane.xlu0 %643  ;;  %v785_v39 = vmul.f32 %v2151_v8, %v2744_v18 }
 0x22c   :  { %v2153_v59 = vpop.eup %2152  ;;  %2162 = vrsqrt.f32 %v727_v55  ;;  %v697_v9 = vmul.f32 0.03125, %v641_v4  ;;  %v698_v1 = vmul.f32 0.03125, %v644_v43 }
 0x22d   :  { %v811_v34 = vpack.c.bf16 %v785_v39, %v784_v47  ;;  %2164 = vrsqrt.f32 %v728_v32  ;;  %v786_v3 = vmul.f32 %v2153_v59, %v2750_v16 }
 0x22e   :  { %v2155_v57 = vpop.eup %2154  ;;  %v729_v41 = vadd.f32 1e-05, %v697_v9  ;;  %v730_v19 = vadd.f32 1e-05, %v698_v1 }
 0x22f   :  { %v647_v0 = vpop.xlane.xlu1 %646  ;;  %2056 = vmatmul.mubr.msk.bf16.gmra.mrb[24].mxu1 %vm388_vm2, %v811_v34  ;;  %v650_v52 = vpop.xlane.xlu0 %649  ;;  %v787_v46 = vmul.f32 %v2155_v57, %v2756_v40 }
 0x230   :  { %v2157_v17 = vpop.eup %2156  ;;  %2166 = vrsqrt.f32 %v729_v41  ;;  %v699_v18 = vmul.f32 0.03125, %v647_v0  ;;  %v700_v29 = vmul.f32 0.03125, %v650_v52 }
 0x231   :  { %v812_v28 = vpack.c.bf16 %v787_v46, %v786_v3  ;;  %2168 = vrsqrt.f32 %v730_v19  ;;  %v788_v36 = vmul.f32 %v2157_v17, %v2762_v49 }
 0x232   :  { %v2159_v26 = vpop.eup %2158  ;;  %v731_v30 = vadd.f32 1e-05, %v699_v18  ;;  %v732_v7 = vadd.f32 1e-05, %v700_v29 }
 0x233   :  { %v653_v31 = vpop.xlane.xlu1 %652  ;;  %2059 = vmatprep.mubr.msk.bf16.mxu1 %vm388_vm2, %v812_v28  ;;  %v656_v45 = vpop.xlane.xlu0 %655  ;;  %v789_v10 = vmul.f32 %v2159_v26, %v2768_v27 }
 0x234   :  { %v2161_v16 = vpop.eup %2160  ;;  %2170 = vrsqrt.f32 %v731_v30  ;;  %v701_v40 = vmul.f32 0.03125, %v653_v31  ;;  %v702_v5 = vmul.f32 0.03125, %v656_v45 }
 0x235   :  { %v813_v60 = vpack.c.bf16 %v789_v10, %v788_v36  ;;  %2172 = vrsqrt.f32 %v732_v7  ;;  %v790_v51 = vmul.f32 %v2161_v16, %v2774_v61 }
 0x236   :  { %v2163_v21 = vpop.eup %2162  ;;  %v733_v37 = vadd.f32 1e-05, %v701_v40  ;;  %v734_v63 = vadd.f32 1e-05, %v702_v5 }
 0x237   :  { %v659_v48 = vpop.xlane.xlu1 %658  ;;  %2060 = vmatmul.mubr.msk.bf16.gmra.mrb[28].mxu1 %vm388_vm2, %v813_v60  ;;  %v662_v14 = vpop.xlane.xlu0 %661  ;;  %v791_v38 = vmul.f32 %v2163_v21, %v2780_v12 }
 0x238   :  { %v2165_v49 = vpop.eup %2164  ;;  %2174 = vrsqrt.f32 %v733_v37  ;;  %v703_v27 = vmul.f32 0.03125, %v659_v48  ;;  %v704_v50 = vmul.f32 0.03125, %v662_v14 }
 0x239   :  { %v814_v54 = vpack.c.bf16 %v791_v38, %v790_v51  ;;  %2176 = vrsqrt.f32 %v734_v63  ;;  %v792_v55 = vmul.f32 %v2165_v49, %v2786_v2 }
 0x23a   :  { %v2167_v24 = vpop.eup %2166  ;;  %v735_v53 = vadd.f32 1e-05, %v703_v27  ;;  %v736_v15 = vadd.f32 1e-05, %v704_v50 }
 0x23b   :  { %v665_v44 = vpop.xlane.xlu1 %664  ;;  %2063 = vmatprep.mubr.msk.bf16.mxu1 %vm388_vm2, %v814_v54  ;;  %v668_v8 = vpop.xlane.xlu0 %667  ;;  %v793_v32 = vmul.f32 %v2167_v24, %v2792_v6 }
 0x23c   :  { %v2169_v61 = vpop.eup %2168  ;;  %2178 = vrsqrt.f32 %v735_v53  ;;  %v705_v12 = vmul.f32 0.03125, %v665_v44  ;;  %v706_v4 = vmul.f32 0.03125, %v668_v8 }
 0x23d   :  { %v815_v43 = vpack.c.bf16 %v793_v32, %v792_v55  ;;  %2180 = vrsqrt.f32 %v736_v15  ;;  %v794_v34 = vmul.f32 %v2169_v61, %v2798_v35 }
 0x23e   :  { %v2171_v47 = vpop.eup %2170  ;;  %v737_v39 = vadd.f32 1e-05, %v705_v12  ;;  %v738_v59 = vadd.f32 1e-05, %v706_v4 }
 0x23f   :  { %v671_v9 = vpop.xlane.xlu1 %670  ;;  %2064 = vmatmul.mubr.msk.bf16.gmra.mrb[32].mxu1 %vm388_vm2, %v815_v43  ;;  %v674_v1 = vpop.xlane.xlu0 %673  ;;  %v795_v57 = vmul.f32 %v2171_v47, %v2807_v42 }
 0x240   :  { %v2173_v2 = vpop.eup %2172  ;;  %2182 = vrsqrt.f32 %v737_v39  ;;  %v707_v6 = vmul.f32 0.03125, %v671_v9  ;;  %v708_v41 = vmul.f32 0.03125, %v674_v1 }
 0x241   :  { %v816_v19 = vpack.c.bf16 %v795_v57, %v794_v34  ;;  %2184 = vrsqrt.f32 %v738_v59  ;;  %v796_v17 = vmul.f32 %v2173_v2, %v2813_v56 }
 0x242   :  { %v2175_v0 = vpop.eup %2174  ;;  %v739_v52 = vadd.f32 1e-05, %v707_v6  ;;  %v740_v3 = vadd.f32 1e-05, %v708_v41 }
 0x243   :  { %v677_v46 = vpop.xlane.xlu1 %676  ;;  %2067 = vmatprep.mubr.msk.bf16.mxu1 %vm388_vm2, %v816_v19  ;;  %v797_v18 = vmul.f32 %v2175_v0, %v2819_v25  ;;  %v2177_v29 = vpop.eup %2176 }
 0x244   :  { %2186 = vrsqrt.f32 %v739_v52  ;;  %v709_v35 = vmul.f32 0.03125, %v677_v46  ;;  %v798_v30 = vmul.f32 %v2177_v29, %v2825_v11 }
 0x245   :  { %v817_v42 = vpack.c.bf16 %v797_v18, %v796_v17  ;;  %2188 = vrsqrt.f32 %v740_v3 }
 0x246   :  { %v2179_v28 = vpop.eup %2178  ;;  %v741_v26 = vadd.f32 1e-05, %v709_v35 }
 0x247   :  { %2068 = vmatmul.mubr.msk.bf16.gmra.mrb[36].mxu1 %vm388_vm2, %v817_v42  ;;  %v799_v7 = vmul.f32 %v2179_v28, %v2831_v62  ;;  %v2181_v31 = vpop.eup %2180 }
 0x248   :  { %2190 = vrsqrt.f32 %v741_v26  ;;  %v800_v56 = vmul.f32 %v2181_v31, %v2837_v23 }
 0x249   :  { %v818_v45 = vpack.c.bf16 %v799_v7, %v798_v30 }
 0x24a   :  { %v2183_v36 = vpop.eup %2182 }
 0x24b   :  { %2071 = vmatprep.mubr.msk.bf16.mxu1 %vm388_vm2, %v818_v45  ;;  %v801_v25 = vmul.f32 %v2183_v36, %v2843_v33  ;;  %v2185_v10 = vpop.eup %2184  ;;  %v2927_v33 = vld [vmem:[%s3508_s4 + $0x1] ss:$0 sm:$0xff] }
 0x24c   :  { %v802_v5 = vmul.f32 %v2185_v10, %v2849_v13 }
 0x24d   :  { %v819_v16 = vpack.c.bf16 %v801_v25, %v800_v56 }
 0x24e   :  { %v2187_v40 = vpop.eup %2186 }
 0x24f   :  { %2072 = vmatmul.mubr.msk.bf16.gmra.mrb[40].mxu1 %vm388_vm2, %v819_v16  ;;  %v803_v11 = vmul.f32 %v2187_v40, %v2855_v58  ;;  %v2189_v62 = vpop.eup %2188 }
 0x250   :  { %v804_v37 = vmul.f32 %v2189_v62, %v2861_v20 }
 0x251   :  { %v820_v60 = vpack.c.bf16 %v803_v11, %v802_v5 }
 0x252   :  { %v2191_v21 = vpop.eup %2190 }
 0x253   :  { %2075 = vmatprep.mubr.msk.bf16.mxu1 %vm388_vm2, %v820_v60  ;;  %v805_v23 = vmul.f32 %v2191_v21, %v2867_v22 }
 0x255   :  { %v821_v63 = vpack.c.bf16 %v805_v23, %v804_v37 }
 0x257   :  { %2076 = vmatmul.mubr.msk.bf16.gmra.mrb[44].mxu1 %vm388_vm2, %v821_v63 }
 0x2f2   :  { %v2049_v13 = vpop.f32.mrb[16].mxu1 }
 0x2f3   :  { %v934_v58 = vadd.f32 %v2049_v13, %v2927_v33  ;;  %v925_v48 = vpop.f32.mrb[17].mxu1 }
 0x2f4   :  { %v926_v14 = vadd.f32 %v2927_v33, %v925_v48  ;;  %v2050_v51 = vpop.f32.mrb[18].mxu1 }
 0x2f5   :  { %v937_v38 = vadd.f32 %v2050_v51, %v2927_v33  ;;  %v928_v20 = vpop.f32.mrb[19].mxu1  ;;  %v1086_v22 = vmul.f32 0.2, %v934_v58  ;;  %vm1054_vm7 = vcmp.ge.f32.partialorder %v934_v58, 0.0 }
 0x2f6   :  { %v1084_v49 = vmul.f32 0.2, %v926_v14  ;;  %v929_v27 = vadd.f32 %v2927_v33, %v928_v20  ;;  %vm1052_vm2 = vcmp.ge.f32.partialorder %v926_v14, 0.0 }
 0x2f7   :  { %v1087_v50 = vmul.f32 0.2, %v937_v38  ;;  %vm1055_vm9 = vcmp.ge.f32.partialorder %v937_v38, 0.0  ;;  %v2939_v8 = vsel %vm1054_vm7, %v934_v58, %v1086_v22 }
 0x2f8   :  { %v1085_v54 = vmul.f32 0.2, %v929_v27  ;;  %v2933_v24 = vsel %vm1052_vm2, %v926_v14, %v1084_v49  ;;  %vm1053_vm8 = vcmp.ge.f32.partialorder %v929_v27, 0.0  ;;  %v1155_v59 = vsel %vm1148_vm6, %v2939_v8, 0.0 }
 0x2f9   :  { %v1149_v53 = vsel %vm1148_vm6, %v2933_v24, 0.0  ;;  %v2945_v43 = vsel %vm1055_vm9, %v937_v38, %v1087_v50 }
 0x2fa   :  { %1150 = vadd.xlane.f32.xlu0 %v1149_v53  ;;  %v2053_v15 = vpop.f32.mrb[20].mxu1  ;;  %v2937_v44 = vsel %vm1053_vm8, %v929_v27, %v1085_v54  ;;  %v1158_v57 = vsel %vm1148_vm6, %v2945_v43, 0.0 }
 0x2fb   :  { %v950_v55 = vadd.f32 %v2053_v15, %v2927_v33  ;;  %v941_v32 = vpop.f32.mrb[21].mxu1  ;;  %v1152_v61 = vsel %vm1148_vm6, %v2937_v44, 0.0 }
 0x2fc   :  { %v942_v12 = vadd.f32 %v2927_v33, %v941_v32  ;;  %1153 = vadd.xlane.f32.xlu1 %v1152_v61  ;;  %v2054_v4 = vpop.f32.mrb[22].mxu1 }
 0x2fd   :  { %v953_v47 = vadd.f32 %v2054_v4, %v2927_v33  ;;  %v944_v39 = vpop.f32.mrb[23].mxu1  ;;  %v1090_v9 = vmul.f32 0.2, %v950_v55  ;;  %vm1058_vm11 = vcmp.ge.f32.partialorder %v950_v55, 0.0 }
 0x2fe   :  { %v1088_v1 = vmul.f32 0.2, %v942_v12  ;;  %v945_v34 = vadd.f32 %v2927_v33, %v944_v39  ;;  %1156 = vadd.xlane.f32.xlu0 %v1155_v59  ;;  %vm1056_vm10 = vcmp.ge.f32.partialorder %v942_v12, 0.0 }
 0x2ff   :  { %v1091_v2 = vmul.f32 0.2, %v953_v47  ;;  %vm1059_vm13 = vcmp.ge.f32.partialorder %v953_v47, 0.0  ;;  %v2959_v3 = vsel %vm1058_vm11, %v950_v55, %v1090_v9 }
 0x300   :  { %v1089_v6 = vmul.f32 0.2, %v945_v34  ;;  %1159 = vadd.xlane.f32.xlu1 %v1158_v57  ;;  %v2953_v41 = vsel %vm1056_vm10, %v942_v12, %v1088_v1  ;;  %vm1057_vm12 = vcmp.ge.f32.partialorder %v945_v34, 0.0  ;;  %v1167_v30 = vsel %vm1148_vm6, %v2959_v3, 0.0 }
 0x301   :  { %v1161_v19 = vsel %vm1148_vm6, %v2953_v41, 0.0  ;;  %v2965_v42 = vsel %vm1059_vm13, %v953_v47, %v1091_v2 }
 0x302   :  { %1162 = vadd.xlane.f32.xlu0 %v1161_v19  ;;  %v2057_v0 = vpop.f32.mrb[24].mxu1  ;;  %v2957_v52 = vsel %vm1057_vm12, %v945_v34, %v1089_v6  ;;  %v1170_v36 = vsel %vm1148_vm6, %v2965_v42, 0.0 }
 0x303   :  { %v966_v46 = vadd.f32 %v2057_v0, %v2927_v33  ;;  %v957_v17 = vpop.f32.mrb[25].mxu1  ;;  %v1164_v18 = vsel %vm1148_vm6, %v2957_v52, 0.0 }
 0x304   :  { %v958_v29 = vadd.f32 %v2927_v33, %v957_v17  ;;  %1165 = vadd.xlane.f32.xlu1 %v1164_v18  ;;  %v2058_v35 = vpop.f32.mrb[26].mxu1 }
 0x305   :  { %v969_v28 = vadd.f32 %v2058_v35, %v2927_v33  ;;  %v960_v26 = vpop.f32.mrb[27].mxu1  ;;  %v1094_v7 = vmul.f32 0.2, %v966_v46  ;;  %vm1062_vm15 = vcmp.ge.f32.partialorder %v966_v46, 0.0 }
 0x306   :  { %v1092_v31 = vmul.f32 0.2, %v958_v29  ;;  %v961_v45 = vadd.f32 %v2927_v33, %v960_v26  ;;  %1168 = vadd.xlane.f32.xlu0 %v1167_v30  ;;  %vm1060_vm14 = vcmp.ge.f32.partialorder %v958_v29, 0.0 }
 0x307   :  { %v1095_v56 = vmul.f32 0.2, %v969_v28  ;;  %vm1063_vm3 = vcmp.ge.f32.partialorder %v969_v28, 0.0  ;;  %v2979_v11 = vsel %vm1062_vm15, %v966_v46, %v1094_v7 }
 0x308   :  { %v1093_v25 = vmul.f32 0.2, %v961_v45  ;;  %1171 = vadd.xlane.f32.xlu1 %v1170_v36  ;;  %v2973_v10 = vsel %vm1060_vm14, %v958_v29, %v1092_v31  ;;  %vm1061_vm1 = vcmp.ge.f32.partialorder %v961_v45, 0.0  ;;  %v1179_v48 = vsel %vm1148_vm6, %v2979_v11, 0.0 }
 0x309   :  { %v1173_v16 = vsel %vm1148_vm6, %v2973_v10, 0.0  ;;  %v2985_v63 = vsel %vm1063_vm3, %v969_v28, %v1095_v56 }
 0x30a   :  { %1174 = vadd.xlane.f32.xlu0 %v1173_v16  ;;  %v2061_v40 = vpop.f32.mrb[28].mxu1  ;;  %v2977_v5 = vsel %vm1061_vm1, %v961_v45, %v1093_v25  ;;  %v1182_v20 = vsel %vm1148_vm6, %v2985_v63, 0.0 }
 0x30b   :  { %v982_v62 = vadd.f32 %v2061_v40, %v2927_v33  ;;  %v973_v60 = vpop.f32.mrb[29].mxu1  ;;  %v1176_v21 = vsel %vm1148_vm6, %v2977_v5, 0.0 }
 0x30c   :  { %v974_v37 = vadd.f32 %v2927_v33, %v973_v60  ;;  %1177 = vadd.xlane.f32.xlu1 %v1176_v21  ;;  %v2062_v23 = vpop.f32.mrb[30].mxu1 }
 0x30d   :  { %v985_v13 = vadd.f32 %v2062_v23, %v2927_v33  ;;  %v976_v58 = vpop.f32.mrb[31].mxu1  ;;  %v1098_v14 = vmul.f32 0.2, %v982_v62  ;;  %vm1066_vm5 = vcmp.ge.f32.partialorder %v982_v62, 0.0 }
 0x30e   :  { %v1096_v51 = vmul.f32 0.2, %v974_v37  ;;  %v977_v38 = vadd.f32 %v2927_v33, %v976_v58  ;;  %1180 = vadd.xlane.f32.xlu0 %v1179_v48  ;;  %vm1064_vm4 = vcmp.ge.f32.partialorder %v974_v37, 0.0 }
 0x30f   :  { %v1099_v22 = vmul.f32 0.2, %v985_v13  ;;  %vm1067_vm7 = vcmp.ge.f32.partialorder %v985_v13, 0.0  ;;  %v2999_v15 = vsel %vm1066_vm5, %v982_v62, %v1098_v14 }
 0x310   :  { %v1097_v49 = vmul.f32 0.2, %v977_v38  ;;  %1183 = vadd.xlane.f32.xlu1 %v1182_v20  ;;  %v2993_v27 = vsel %vm1064_vm4, %v974_v37, %v1096_v51  ;;  %vm1065_vm2 = vcmp.ge.f32.partialorder %v977_v38, 0.0  ;;  %v1191_v9 = vsel %vm1148_vm6, %v2999_v15, 0.0 }
 0x311   :  { %v1185_v50 = vsel %vm1148_vm6, %v2993_v27, 0.0  ;;  %v3005_v47 = vsel %vm1067_vm7, %v985_v13, %v1099_v22 }
 0x312   :  { %1186 = vadd.xlane.f32.xlu0 %v1185_v50  ;;  %v2065_v54 = vpop.f32.mrb[32].mxu1  ;;  %v2997_v53 = vsel %vm1065_vm2, %v977_v38, %v1097_v49  ;;  %v1194_v2 = vsel %vm1148_vm6, %v3005_v47, 0.0 }
 0x313   :  { %v998_v55 = vadd.f32 %v2065_v54, %v2927_v33  ;;  %v989_v32 = vpop.f32.mrb[33].mxu1  ;;  %v1188_v61 = vsel %vm1148_vm6, %v2997_v53, 0.0 }
 0x314   :  { %v990_v12 = vadd.f32 %v2927_v33, %v989_v32  ;;  %1189 = vadd.xlane.f32.xlu1 %v1188_v61  ;;  %v2066_v4 = vpop.f32.mrb[34].mxu1 }
 0x315   :  { %v1001_v39 = vadd.f32 %v2066_v4, %v2927_v33  ;;  %v992_v59 = vpop.f32.mrb[35].mxu1  ;;  %v1102_v1 = vmul.f32 0.2, %v998_v55  ;;  %vm1070_vm9 = vcmp.ge.f32.partialorder %v998_v55, 0.0 }
 0x316   :  { %v1100_v34 = vmul.f32 0.2, %v990_v12  ;;  %v993_v57 = vadd.f32 %v2927_v33, %v992_v59  ;;  %1192 = vadd.xlane.f32.xlu0 %v1191_v9  ;;  %vm1068_vm8 = vcmp.ge.f32.partialorder %v990_v12, 0.0 }
 0x317   :  { %v1103_v6 = vmul.f32 0.2, %v1001_v39  ;;  %vm1071_vm11 = vcmp.ge.f32.partialorder %v1001_v39, 0.0  ;;  %v3019_v29 = vsel %vm1070_vm9, %v998_v55, %v1102_v1 }
 0x318   :  { %v1101_v19 = vmul.f32 0.2, %v993_v57  ;;  %1195 = vadd.xlane.f32.xlu1 %v1194_v2  ;;  %v3013_v0 = vsel %vm1068_vm8, %v990_v12, %v1100_v34  ;;  %vm1069_vm10 = vcmp.ge.f32.partialorder %v993_v57, 0.0  ;;  %v1203_v56 = vsel %vm1148_vm6, %v3019_v29, 0.0 }
 0x319   :  { %v1197_v46 = vsel %vm1148_vm6, %v3013_v0, 0.0  ;;  %v3025_v31 = vsel %vm1071_vm11, %v1001_v39, %v1103_v6 }
 0x31a   :  { %1198 = vadd.xlane.f32.xlu0 %v1197_v46  ;;  %v2069_v17 = vpop.f32.mrb[36].mxu1  ;;  %v3017_v18 = vsel %vm1069_vm10, %v993_v57, %v1101_v19  ;;  %v1206_v62 = vsel %vm1148_vm6, %v3025_v31, 0.0 }
 0x31b   :  { %v1014_v35 = vadd.f32 %v2069_v17, %v2927_v33  ;;  %v1005_v28 = vpop.f32.mrb[37].mxu1  ;;  %v1200_v26 = vsel %vm1148_vm6, %v3017_v18, 0.0 }
 0x31c   :  { %v1006_v30 = vadd.f32 %v2927_v33, %v1005_v28  ;;  %1201 = vadd.xlane.f32.xlu1 %v1200_v26  ;;  %v2070_v7 = vpop.f32.mrb[38].mxu1 }
 0x31d   :  { %v1017_v45 = vadd.f32 %v2070_v7, %v2927_v33  ;;  %v1008_v36 = vpop.f32.mrb[39].mxu1  ;;  %v1106_v25 = vmul.f32 0.2, %v1014_v35  ;;  %vm1074_vm13 = vcmp.ge.f32.partialorder %v1014_v35, 0.0 }
 0x31e   :  { %v1104_v16 = vmul.f32 0.2, %v1006_v30  ;;  %v1009_v40 = vadd.f32 %v2927_v33, %v1008_v36  ;;  %1204 = vadd.xlane.f32.xlu0 %v1203_v56  ;;  %vm1072_vm12 = vcmp.ge.f32.partialorder %v1006_v30, 0.0 }
 0x31f   :  { %v1107_v60 = vmul.f32 0.2, %v1017_v45  ;;  %vm1075_vm15 = vcmp.ge.f32.partialorder %v1017_v45, 0.0  ;;  %v3039_v48 = vsel %vm1074_vm13, %v1014_v35, %v1106_v25 }
 0x320   :  { %v1105_v21 = vmul.f32 0.2, %v1009_v40  ;;  %1207 = vadd.xlane.f32.xlu1 %v1206_v62  ;;  %v3033_v37 = vsel %vm1072_vm12, %v1006_v30, %v1104_v16  ;;  %vm1073_vm14 = vcmp.ge.f32.partialorder %v1009_v40, 0.0  ;;  %v1215_v55 = vsel %vm1148_vm6, %v3039_v48, 0.0 }
 0x321   :  { %v1209_v23 = vsel %vm1148_vm6, %v3033_v37, 0.0  ;;  %v3045_v49 = vsel %vm1075_vm15, %v1017_v45, %v1107_v60 }
 0x322   :  { %1210 = vadd.xlane.f32.xlu0 %v1209_v23  ;;  %v2073_v13 = vpop.f32.mrb[40].mxu1  ;;  %v3037_v58 = vsel %vm1073_vm14, %v1009_v40, %v1105_v21  ;;  %v1218_v4 = vsel %vm1148_vm6, %v3045_v49, 0.0 }
 0x323   :  { %v1030_v14 = vadd.f32 %v2073_v13, %v2927_v33  ;;  %v1021_v51 = vpop.f32.mrb[41].mxu1  ;;  %v1212_v38 = vsel %vm1148_vm6, %v3037_v58, 0.0 }
 0x324   :  { %v1022_v20 = vadd.f32 %v2927_v33, %v1021_v51  ;;  %1213 = vadd.xlane.f32.xlu1 %v1212_v38  ;;  %v2074_v22 = vpop.f32.mrb[42].mxu1  ;;  %v2124_v38 = vld [vmem:[%s3510_s3] sm:$0xff]  }
 0x325   :  { %v1033_v50 = vadd.f32 %v2074_v22, %v2927_v33  ;;  %v1024_v54 = vpop.f32.mrb[43].mxu1  ;;  %v1110_v32 = vmul.f32 0.2, %v1030_v14  ;;  %vm1078_vm3 = vcmp.ge.f32.partialorder %v1030_v14, 0.0  ;;  %2079 = vmatprep.subr.bf16.mxu0 %v2124_v38 }
 0x326   :  { %v1108_v61 = vmul.f32 0.2, %v1022_v20  ;;  %v1025_v12 = vadd.f32 %v2927_v33, %v1024_v54  ;;  %1216 = vadd.xlane.f32.xlu0 %v1215_v55  ;;  %vm1076_vm1 = vcmp.ge.f32.partialorder %v1022_v20, 0.0  ;;  %2080 = vmatpush3.bf16.msra.mxu0 %v2124_v38 }
 0x327   :  { %v1111_v39 = vmul.f32 0.2, %v1033_v50  ;;  %vm1079_vm5 = vcmp.ge.f32.partialorder %v1033_v50, 0.0  ;;  %v3059_v2 = vsel %vm1078_vm3, %v1030_v14, %v1110_v32 }
 0x328   :  { %v1109_v59 = vmul.f32 0.2, %v1025_v12  ;;  %1219 = vadd.xlane.f32.xlu1 %v1218_v4  ;;  %v3053_v9 = vsel %vm1076_vm1, %v1022_v20, %v1108_v61  ;;  %vm1077_vm4 = vcmp.ge.f32.partialorder %v1025_v12, 0.0  ;;  %v1227_v7 = vsel %vm1148_vm6, %v3059_v2, 0.0 }
 0x329   :  { %v1221_v1 = vsel %vm1148_vm6, %v3053_v9, 0.0  ;;  %v3065_v28 = vsel %vm1079_vm5, %v1033_v50, %v1111_v39 }
 0x32a   :  { %1222 = vadd.xlane.f32.xlu0 %v1221_v1  ;;  %v2077_v34 = vpop.f32.mrb[44].mxu1  ;;  %v3057_v57 = vsel %vm1077_vm4, %v1025_v12, %v1109_v59  ;;  %v1230_v25 = vsel %vm1148_vm6, %v3065_v28, 0.0 }
 0x32b   :  { %v1046_v6 = vadd.f32 %v2077_v34, %v2927_v33  ;;  %v1037_v19 = vpop.f32.mrb[45].mxu1  ;;  %v1224_v46 = vsel %vm1148_vm6, %v3057_v57, 0.0 }
 0x32c   :  { %v1038_v17 = vadd.f32 %v2927_v33, %v1037_v19  ;;  %1225 = vadd.xlane.f32.xlu1 %v1224_v46  ;;  %v2078_v35 = vpop.f32.mrb[46].mxu1 }
 0x32d   :  { %v1049_v26 = vadd.f32 %v2078_v35, %v2927_v33  ;;  %v1040_v30 = vpop.f32.mrb[47].mxu1  ;;  %v1114_v45 = vmul.f32 0.2, %v1046_v6  ;;  %vm1082_vm7 = vcmp.ge.f32.partialorder %v1046_v6, 0.0 }
 0x32e   :  { %v1112_v36 = vmul.f32 0.2, %v1038_v17  ;;  %v1041_v56 = vadd.f32 %v2927_v33, %v1040_v30  ;;  %1228 = vadd.xlane.f32.xlu0 %v1227_v7  ;;  %vm1080_vm2 = vcmp.ge.f32.partialorder %v1038_v17, 0.0 }
 0x32f   :  { %v1115_v16 = vmul.f32 0.2, %v1049_v26  ;;  %vm1083_vm9 = vcmp.ge.f32.partialorder %v1049_v26, 0.0  ;;  %v3079_v33 = vsel %vm1082_vm7, %v1046_v6, %v1114_v45 }
 0x330   :  { %v1113_v40 = vmul.f32 0.2, %v1041_v56  ;;  %1231 = vadd.xlane.f32.xlu1 %v1230_v25  ;;  %v3073_v62 = vsel %vm1080_vm2, %v1038_v17, %v1112_v36  ;;  %vm1081_vm8 = vcmp.ge.f32.partialorder %v1041_v56, 0.0  ;;  %v1239_v14 = vsel %vm1148_vm6, %v3079_v33, 0.0 }
 0x331   :  { %v1233_v60 = vsel %vm1148_vm6, %v3073_v62, 0.0  ;;  %v3083_v13 = vsel %vm1083_vm9, %v1049_v26, %v1115_v16 }
 0x332   :  { %1234 = vadd.xlane.f32.xlu0 %v1233_v60  ;;  %v3077_v21 = vsel %vm1081_vm8, %v1041_v56, %v1113_v40  ;;  %v1242_v51 = vsel %vm1148_vm6, %v3083_v13, 0.0 }
 0x333   :  { %v1236_v23 = vsel %vm1148_vm6, %v3077_v21, 0.0 }
 0x334   :  { %1237 = vadd.xlane.f32.xlu1 %v1236_v23 }
 0x336   :  { %1240 = vadd.xlane.f32.xlu0 %v1239_v14 }
 0x338   :  { %1243 = vadd.xlane.f32.xlu1 %v1242_v51 }
 0x387   :  { %v1151_v20 = vpop.xlane.xlu0 %1150 }
 0x388   :  { %v1246_v22 = vmul.f32 0.015625, %v1151_v20 }
 0x389   :  { %v1154_v50 = vpop.xlane.xlu1 %1153 }
 0x38a   :  { %v3093_v54 = vsub.f32 %v2933_v24, %v1246_v22  ;;  %v1247_v55 = vmul.f32 0.015625, %v1154_v50 }
 0x38b   :  { %v1157_v32 = vpop.xlane.xlu0 %1156 }
 0x38c   :  { %v3096_v61 = vsub.f32 %v2937_v44, %v1247_v55  ;;  %v1248_v12 = vmul.f32 0.015625, %v1157_v32  ;;  %v1310_v4 = vmul.f32 %v3093_v54, %v3093_v54 }
 0x38d   :  { %v1160_v39 = vpop.xlane.xlu1 %1159 }
 0x38e   :  { %v3101_v59 = vsub.f32 %v2939_v8, %v1248_v12  ;;  %v1249_v1 = vmul.f32 0.015625, %v1160_v39  ;;  %v1342_v34 = vsel %vm1148_vm6, %v1310_v4, 0.0  ;;  %v1311_v24 = vmul.f32 %v3096_v61, %v3096_v61 }
 0x38f   :  { %1343 = vadd.xlane.f32.xlu0 %v1342_v34  ;;  %v1163_v6 = vpop.xlane.xlu0 %1162 }
 0x390   :  { %v3107_v19 = vsub.f32 %v2945_v43, %v1249_v1  ;;  %v1250_v44 = vmul.f32 0.015625, %v1163_v6  ;;  %v1345_v46 = vsel %vm1148_vm6, %v1311_v24, 0.0  ;;  %v1312_v17 = vmul.f32 %v3101_v59, %v3101_v59 }
 0x391   :  { %v1166_v35 = vpop.xlane.xlu1 %1165  ;;  %1346 = vadd.xlane.f32.xlu1 %v1345_v46 }
 0x392   :  { %v3113_v8 = vsub.f32 %v2953_v41, %v1250_v44  ;;  %v1251_v26 = vmul.f32 0.015625, %v1166_v35  ;;  %v1348_v30 = vsel %vm1148_vm6, %v1312_v17, 0.0  ;;  %v1313_v7 = vmul.f32 %v3107_v19, %v3107_v19 }
 0x393   :  { %1349 = vadd.xlane.f32.xlu0 %v1348_v30  ;;  %v1169_v43 = vpop.xlane.xlu0 %1168 }
 0x394   :  { %v3119_v45 = vsub.f32 %v2957_v52, %v1251_v26  ;;  %v1252_v36 = vmul.f32 0.015625, %v1169_v43  ;;  %v1351_v56 = vsel %vm1148_vm6, %v1313_v7, 0.0  ;;  %v1314_v25 = vmul.f32 %v3113_v8, %v3113_v8 }
 0x395   :  { %v1172_v16 = vpop.xlane.xlu1 %1171  ;;  %1352 = vadd.xlane.f32.xlu1 %v1351_v56 }
 0x396   :  { %v3125_v41 = vsub.f32 %v2959_v3, %v1252_v36  ;;  %v1253_v40 = vmul.f32 0.015625, %v1172_v16  ;;  %v1354_v60 = vsel %vm1148_vm6, %v1314_v25, 0.0  ;;  %v1315_v23 = vmul.f32 %v3119_v45, %v3119_v45 }
 0x397   :  { %1355 = vadd.xlane.f32.xlu0 %v1354_v60  ;;  %v1175_v52 = vpop.xlane.xlu0 %1174 }
 0x398   :  { %v3131_v14 = vsub.f32 %v2965_v42, %v1253_v40  ;;  %v1254_v51 = vmul.f32 0.015625, %v1175_v52  ;;  %v1357_v38 = vsel %vm1148_vm6, %v1315_v23, 0.0  ;;  %v1316_v20 = vmul.f32 %v3125_v41, %v3125_v41 }
 0x399   :  { %v1178_v22 = vpop.xlane.xlu1 %1177  ;;  %1358 = vadd.xlane.f32.xlu1 %v1357_v38 }
 0x39a   :  { %v3137_v3 = vsub.f32 %v2973_v10, %v1254_v51  ;;  %v1255_v50 = vmul.f32 0.015625, %v1178_v22  ;;  %v1360_v55 = vsel %vm1148_vm6, %v1316_v20, 0.0  ;;  %v1317_v32 = vmul.f32 %v3131_v14, %v3131_v14 }
 0x39b   :  { %1361 = vadd.xlane.f32.xlu0 %v1360_v55  ;;  %v1181_v42 = vpop.xlane.xlu0 %1180 }
 0x39c   :  { %v3143_v12 = vsub.f32 %v2977_v5, %v1255_v50  ;;  %v1256_v4 = vmul.f32 0.015625, %v1181_v42  ;;  %v1363_v39 = vsel %vm1148_vm6, %v1317_v32, 0.0  ;;  %v1318_v1 = vmul.f32 %v3137_v3, %v3137_v3 }
 0x39d   :  { %v1184_v34 = vpop.xlane.xlu1 %1183  ;;  %1364 = vadd.xlane.f32.xlu1 %v1363_v39 }
 0x39e   :  { %v3149_v10 = vsub.f32 %v2979_v11, %v1256_v4  ;;  %v1257_v24 = vmul.f32 0.015625, %v1184_v34  ;;  %v1366_v6 = vsel %vm1148_vm6, %v1318_v1, 0.0  ;;  %v1319_v44 = vmul.f32 %v3143_v12, %v3143_v12  ;;  %v2125_v11 = vld [vmem:[%s3510_s3 + $0x8] sm:$0xff]  }
 0x39f   :  { %1367 = vadd.xlane.f32.xlu0 %v1366_v6  ;;  %v1187_v5 = vpop.xlane.xlu0 %1186  ;;  %2081 = vmatprep.subr.bf16.mxu0 %v2125_v11 }
 0x3a0   :  { %v3155_v46 = vsub.f32 %v2985_v63, %v1257_v24  ;;  %v1258_v17 = vmul.f32 0.015625, %v1187_v5  ;;  %v1369_v35 = vsel %vm1148_vm6, %v1319_v44, 0.0  ;;  %v1320_v26 = vmul.f32 %v3149_v10, %v3149_v10  ;;  %2082 = vmatpush3.bf16.msra.mxu0 %v2125_v11 }
 0x3a1   :  { %v1190_v30 = vpop.xlane.xlu1 %1189  ;;  %1370 = vadd.xlane.f32.xlu1 %v1369_v35 }
 0x3a2   :  { %v3164_v7 = vsub.f32 %v2993_v27, %v1258_v17  ;;  %v1259_v43 = vmul.f32 0.015625, %v1190_v30  ;;  %v1372_v36 = vsel %vm1148_vm6, %v1320_v26, 0.0  ;;  %v1321_v63 = vmul.f32 %v3155_v46, %v3155_v46 }
 0x3a3   :  { %1373 = vadd.xlane.f32.xlu0 %v1372_v36  ;;  %v1193_v56 = vpop.xlane.xlu0 %1192 }
 0x3a4   :  { %v3170_v25 = vsub.f32 %v2997_v53, %v1259_v43  ;;  %v1260_v16 = vmul.f32 0.015625, %v1193_v56  ;;  %v1375_v40 = vsel %vm1148_vm6, %v1321_v63, 0.0  ;;  %v1322_v60 = vmul.f32 %v3164_v7, %v3164_v7  ;;  %v2127_v63 = vld [vmem:[%s3510_s3 + $0x18] sm:$0xff]  }
 0x3a5   :  { %v1196_v27 = vpop.xlane.xlu1 %1195  ;;  %1376 = vadd.xlane.f32.xlu1 %v1375_v40 }
 0x3a6   :  { %v3176_v23 = vsub.f32 %v2999_v15, %v1260_v16  ;;  %v1261_v52 = vmul.f32 0.015625, %v1196_v27  ;;  %v1378_v51 = vsel %vm1148_vm6, %v1322_v60, 0.0  ;;  %v1323_v38 = vmul.f32 %v3170_v25, %v3170_v25 }
 0x3a7   :  { %1379 = vadd.xlane.f32.xlu0 %v1378_v51  ;;  %v1199_v53 = vpop.xlane.xlu0 %1198 }
 0x3a8   :  { %v3182_v20 = vsub.f32 %v3005_v47, %v1261_v52  ;;  %v1262_v22 = vmul.f32 0.015625, %v1199_v53  ;;  %v1381_v50 = vsel %vm1148_vm6, %v1323_v38, 0.0  ;;  %v1324_v55 = vmul.f32 %v3176_v23, %v3176_v23 }
 0x3a9   :  { %v1202_v32 = vpop.xlane.xlu1 %1201  ;;  %1382 = vadd.xlane.f32.xlu1 %v1381_v50 }
 0x3aa   :  { %v3188_v15 = vsub.f32 %v3013_v0, %v1262_v22  ;;  %v1263_v42 = vmul.f32 0.015625, %v1202_v32  ;;  %v1384_v4 = vsel %vm1148_vm6, %v1324_v55, 0.0  ;;  %v1325_v39 = vmul.f32 %v3182_v20, %v3182_v20  ;;  %v2126_v0 = vld [vmem:[%s3510_s3 + $0x10] sm:$0xff]  }
 0x3ab   :  { %1385 = vadd.xlane.f32.xlu0 %v1384_v4  ;;  %v1205_v47 = vpop.xlane.xlu0 %1204  ;;  %2083 = vmatprep.subr.bf16.mxu0 %v2126_v0 }
 0x3ac   :  { %v3194_v1 = vsub.f32 %v3017_v18, %v1263_v42  ;;  %v1264_v34 = vmul.f32 0.015625, %v1205_v47  ;;  %v1387_v24 = vsel %vm1148_vm6, %v1325_v39, 0.0  ;;  %v1326_v6 = vmul.f32 %v3188_v15, %v3188_v15  ;;  %2084 = vmatpush3.bf16.msra.mxu0 %v2126_v0 }
 0x3ad   :  { %v1208_v44 = vpop.xlane.xlu1 %1207  ;;  %1388 = vadd.xlane.f32.xlu1 %v1387_v24  ;;  %2085 = vmatprep.subr.bf16.mxu0 %v2127_v63 }
 0x3ae   :  { %v3203_v5 = vsub.f32 %v3019_v29, %v1264_v34  ;;  %v1265_v17 = vmul.f32 0.015625, %v1208_v44  ;;  %v1390_v35 = vsel %vm1148_vm6, %v1326_v6, 0.0  ;;  %v1327_v18 = vmul.f32 %v3194_v1, %v3194_v1 }
 0x3af   :  { %1391 = vadd.xlane.f32.xlu0 %v1390_v35  ;;  %v1211_v26 = vpop.xlane.xlu0 %1210 }
 0x3b0   :  { %v3209_v30 = vsub.f32 %v3025_v31, %v1265_v17  ;;  %v1266_v11 = vmul.f32 0.015625, %v1211_v26  ;;  %v1393_v43 = vsel %vm1148_vm6, %v1327_v18, 0.0  ;;  %v1328_v36 = vmul.f32 %v3203_v5, %v3203_v5  ;;  %2086 = vmatpush3.bf16.msra.mxu0 %v2127_v63 }
 0x3b1   :  { %v1214_v29 = vpop.xlane.xlu1 %1213  ;;  %1394 = vadd.xlane.f32.xlu1 %v1393_v43 }
 0x3b2   :  { %v3218_v56 = vsub.f32 %v3033_v37, %v1266_v11  ;;  %v1267_v16 = vmul.f32 0.015625, %v1214_v29  ;;  %v1396_v31 = vsel %vm1148_vm6, %v1328_v36, 0.0  ;;  %v1329_v40 = vmul.f32 %v3209_v30, %v3209_v30 }
 0x3b3   :  { %1397 = vadd.xlane.f32.xlu0 %v1396_v31  ;;  %v1217_v60 = vpop.xlane.xlu0 %1216 }
 0x3b4   :  { %v3224_v27 = vsub.f32 %v3037_v58, %v1267_v16  ;;  %v1268_v52 = vmul.f32 0.015625, %v1217_v60  ;;  %v1399_v51 = vsel %vm1148_vm6, %v1329_v40, 0.0  ;;  %v1330_v38 = vmul.f32 %v3218_v56, %v3218_v56 }
 0x3b5   :  { %v1220_v37 = vpop.xlane.xlu1 %1219  ;;  %1400 = vadd.xlane.f32.xlu1 %v1399_v51 }
 0x3b6   :  { %v3230_v53 = vsub.f32 %v3039_v48, %v1268_v52  ;;  %v1269_v22 = vmul.f32 0.015625, %v1220_v37  ;;  %v1402_v50 = vsel %vm1148_vm6, %v1330_v38, 0.0  ;;  %v1331_v55 = vmul.f32 %v3224_v27, %v3224_v27 }
 0x3b7   :  { %1403 = vadd.xlane.f32.xlu0 %v1402_v50  ;;  %v1223_v58 = vpop.xlane.xlu0 %1222 }
 0x3b8   :  { %v3236_v32 = vsub.f32 %v3045_v49, %v1269_v22  ;;  %v1270_v42 = vmul.f32 0.015625, %v1223_v58  ;;  %v1405_v4 = vsel %vm1148_vm6, %v1331_v55, 0.0  ;;  %v1332_v39 = vmul.f32 %v3230_v53, %v3230_v53 }
 0x3b9   :  { %v1226_v47 = vpop.xlane.xlu1 %1225  ;;  %1406 = vadd.xlane.f32.xlu1 %v1405_v4 }
 0x3ba   :  { %v3242_v48 = vsub.f32 %v3053_v9, %v1270_v42  ;;  %v1271_v34 = vmul.f32 0.015625, %v1226_v47  ;;  %v1408_v24 = vsel %vm1148_vm6, %v1332_v39, 0.0  ;;  %v1333_v6 = vmul.f32 %v3236_v32, %v3236_v32 }
 0x3bb   :  { %1409 = vadd.xlane.f32.xlu0 %v1408_v24  ;;  %v1229_v49 = vpop.xlane.xlu0 %1228 }
 0x3bc   :  { %v3248_v44 = vsub.f32 %v3057_v57, %v1271_v34  ;;  %v1272_v0 = vmul.f32 0.015625, %v1229_v49  ;;  %v1411_v17 = vsel %vm1148_vm6, %v1333_v6, 0.0  ;;  %v1334_v35 = vmul.f32 %v3242_v48, %v3242_v48 }
 0x3bd   :  { %v1232_v18 = vpop.xlane.xlu1 %1231  ;;  %1412 = vadd.xlane.f32.xlu1 %v1411_v17 }
 0x3be   :  { %v3254_v9 = vsub.f32 %v3059_v2, %v1272_v0  ;;  %v1273_v26 = vmul.f32 0.015625, %v1232_v18  ;;  %v1414_v11 = vsel %vm1148_vm6, %v1334_v35, 0.0  ;;  %v1335_v43 = vmul.f32 %v3248_v44, %v3248_v44 }
 0x3bf   :  { %1415 = vadd.xlane.f32.xlu0 %v1414_v11  ;;  %v1235_v57 = vpop.xlane.xlu0 %1234 }
 0x3c0   :  { %v3260_v36 = vsub.f32 %v3065_v28, %v1273_v26  ;;  %v1274_v29 = vmul.f32 0.015625, %v1235_v57  ;;  %v1417_v63 = vsel %vm1148_vm6, %v1335_v43, 0.0  ;;  %v1336_v16 = vmul.f32 %v3254_v9, %v3254_v9 }
 0x3c1   :  { %1418 = vadd.xlane.f32.xlu1 %v1417_v63  ;;  %v1238_v2 = vpop.xlane.xlu1 %1237 }
 0x3c2   :  { %v3266_v31 = vsub.f32 %v3073_v62, %v1274_v29  ;;  %v1275_v40 = vmul.f32 0.015625, %v1238_v2  ;;  %v1420_v60 = vsel %vm1148_vm6, %v1336_v16, 0.0  ;;  %v1337_v52 = vmul.f32 %v3260_v36, %v3260_v36 }
 0x3c3   :  { %1421 = vadd.xlane.f32.xlu0 %v1420_v60  ;;  %v1241_v28 = vpop.xlane.xlu0 %1240 }
 0x3c4   :  { %v3272_v51 = vsub.f32 %v3077_v21, %v1275_v40  ;;  %v1276_v38 = vmul.f32 0.015625, %v1241_v28  ;;  %v1423_v37 = vsel %vm1148_vm6, %v1337_v52, 0.0  ;;  %v1338_v22 = vmul.f32 %v3266_v31, %v3266_v31 }
 0x3c5   :  { %1424 = vadd.xlane.f32.xlu1 %v1423_v37  ;;  %v1244_v62 = vpop.xlane.xlu1 %1243 }
 0x3c6   :  { %v3278_v50 = vsub.f32 %v3079_v33, %v1276_v38  ;;  %v1277_v55 = vmul.f32 0.015625, %v1244_v62  ;;  %v1426_v58 = vsel %vm1148_vm6, %v1338_v22, 0.0  ;;  %v1339_v42 = vmul.f32 %v3272_v51, %v3272_v51 }
 0x3c7   :  { %1427 = vadd.xlane.f32.xlu0 %v1426_v58 }
 0x3c8   :  { %v3284_v21 = vsub.f32 %v3083_v13, %v1277_v55  ;;  %v1429_v4 = vsel %vm1148_vm6, %v1339_v42, 0.0  ;;  %v1340_v39 = vmul.f32 %v3278_v50, %v3278_v50 }
 0x3c9   :  { %1430 = vadd.xlane.f32.xlu1 %v1429_v4 }
 0x3ca   :  { %v1432_v47 = vsel %vm1148_vm6, %v1340_v39, 0.0  ;;  %v1341_v33 = vmul.f32 %v3284_v21, %v3284_v21 }
 0x3cb   :  { %1433 = vadd.xlane.f32.xlu0 %v1432_v47 }
 0x3cc   :  { %v1435_v34 = vsel %vm1148_vm6, %v1341_v33, 0.0 }
 0x3cd   :  { %1436 = vadd.xlane.f32.xlu1 %v1435_v34 }
 0x41c   :  { %v1344_v24 = vpop.xlane.xlu0 %1343 }
 0x41d   :  { %v1438_v6 = vmul.f32 0.015625, %v1344_v24 }
 0x41e   :  { %v1347_v49 = vpop.xlane.xlu1 %1346 }
 0x41f   :  { %v1470_v13 = vadd.f32 1e-05, %v1438_v6  ;;  %v1439_v0 = vmul.f32 0.015625, %v1347_v49 }
 0x420   :  { %v1350_v17 = vpop.xlane.xlu0 %1349 }
 0x421   :  { %2192 = vrsqrt.f32 %v1470_v13  ;;  %v1471_v35 = vadd.f32 1e-05, %v1439_v0  ;;  %v1440_v18 = vmul.f32 0.015625, %v1350_v17 }
 0x422   :  { %v1353_v26 = vpop.xlane.xlu1 %1352 }
 0x423   :  { %2194 = vrsqrt.f32 %v1471_v35  ;;  %v1472_v11 = vadd.f32 1e-05, %v1440_v18  ;;  %v1441_v43 = vmul.f32 0.015625, %v1353_v26 }
 0x424   :  { %v1356_v57 = vpop.xlane.xlu0 %1355 }
 0x425   :  { %2196 = vrsqrt.f32 %v1472_v11  ;;  %v1473_v29 = vadd.f32 1e-05, %v1441_v43  ;;  %v1442_v63 = vmul.f32 0.015625, %v1356_v57 }
 0x426   :  { %v1359_v16 = vpop.xlane.xlu1 %1358 }
 0x427   :  { %2198 = vrsqrt.f32 %v1473_v29  ;;  %v1474_v2 = vadd.f32 1e-05, %v1442_v63  ;;  %v1443_v40 = vmul.f32 0.015625, %v1359_v16 }
 0x428   :  { %v1362_v60 = vpop.xlane.xlu0 %1361 }
 0x429   :  { %2200 = vrsqrt.f32 %v1474_v2  ;;  %v1475_v52 = vadd.f32 1e-05, %v1443_v40  ;;  %v1444_v28 = vmul.f32 0.015625, %v1362_v60 }
 0x42a   :  { %v1365_v38 = vpop.xlane.xlu1 %1364 }
 0x42b   :  { %v2193_v37 = vpop.eup %2192  ;;  %2202 = vrsqrt.f32 %v1475_v52  ;;  %v1476_v22 = vadd.f32 1e-05, %v1444_v28  ;;  %v1445_v62 = vmul.f32 0.015625, %v1365_v38 }
 0x42c   :  { %v1368_v55 = vpop.xlane.xlu0 %1367  ;;  %v1534_v47 = vmul.f32 %v2193_v37, %v3093_v54 }
 0x42d   :  { %v2195_v58 = vpop.eup %2194  ;;  %2204 = vrsqrt.f32 %v1476_v22  ;;  %v1477_v42 = vadd.f32 1e-05, %v1445_v62  ;;  %v1446_v4 = vmul.f32 0.015625, %v1368_v55 }
 0x42e   :  { %v1371_v39 = vpop.xlane.xlu1 %1370  ;;  %v1535_v33 = vmul.f32 %v2195_v58, %v3096_v61 }
 0x42f   :  { %v2197_v34 = vpop.eup %2196  ;;  %2206 = vrsqrt.f32 %v1477_v42  ;;  %v1478_v24 = vadd.f32 1e-05, %v1446_v4  ;;  %v1447_v6 = vmul.f32 0.015625, %v1371_v39 }
 0x430   :  { %v1374_v49 = vpop.xlane.xlu0 %1373  ;;  %v1566_v13 = vpack.c.bf16 %v1535_v33, %v1534_v47  ;;  %v1536_v18 = vmul.f32 %v2197_v34, %v3101_v59 }
 0x431   :  { %v2199_v0 = vpop.eup %2198  ;;  %2208 = vrsqrt.f32 %v1478_v24  ;;  %v1479_v17 = vadd.f32 1e-05, %v1447_v6  ;;  %v1448_v35 = vmul.f32 0.015625, %v1374_v49 }
 0x432   :  { %v1537_v26 = vmul.f32 %v2199_v0, %v3107_v19  ;;  %v1377_v11 = vpop.xlane.xlu1 %1376  ;;  %2087 = vmatprep.mubr.msk.bf16.mxu0 %vm1148_vm6, %v1566_v13 }
 0x433   :  { %v2201_v54 = vpop.eup %2200  ;;  %2210 = vrsqrt.f32 %v1479_v17  ;;  %v1480_v61 = vadd.f32 1e-05, %v1448_v35  ;;  %v1449_v43 = vmul.f32 0.015625, %v1377_v11 }
 0x434   :  { %v1567_v57 = vpack.c.bf16 %v1537_v26, %v1536_v18  ;;  %v1380_v29 = vpop.xlane.xlu0 %1379  ;;  %v1538_v59 = vmul.f32 %v2201_v54, %v3113_v8 }
 0x435   :  { %v2203_v63 = vpop.eup %2202  ;;  %2212 = vrsqrt.f32 %v1480_v61  ;;  %v1481_v16 = vadd.f32 1e-05, %v1449_v43  ;;  %v1450_v2 = vmul.f32 0.015625, %v1380_v29 }
 0x436   :  { %v1383_v40 = vpop.xlane.xlu1 %1382  ;;  %2088 = vmatmul.mubr.msk.bf16.vlgmr.msra.gmra.mrb[16].mxu0 %vm1148_vm6, %v1567_v57  ;;  %v1539_v19 = vmul.f32 %v2203_v63, %v3119_v45 }
 0x437   :  { %v2205_v60 = vpop.eup %2204  ;;  %2214 = vrsqrt.f32 %v1481_v16  ;;  %v1482_v52 = vadd.f32 1e-05, %v1450_v2  ;;  %v1451_v28 = vmul.f32 0.015625, %v1383_v40 }
 0x438   :  { %v1386_v38 = vpop.xlane.xlu0 %1385  ;;  %v1568_v37 = vpack.c.bf16 %v1539_v19, %v1538_v59  ;;  %v1540_v42 = vmul.f32 %v2205_v60, %v3125_v41 }
 0x439   :  { %v2207_v22 = vpop.eup %2206  ;;  %2216 = vrsqrt.f32 %v1482_v52  ;;  %v1483_v62 = vadd.f32 1e-05, %v1451_v28  ;;  %v1452_v55 = vmul.f32 0.015625, %v1386_v38 }
 0x43a   :  { %v1389_v58 = vpop.xlane.xlu1 %1388  ;;  %2091 = vmatprep.mubr.msk.bf16.mxu0 %vm1148_vm6, %v1568_v37  ;;  %v1541_v4 = vmul.f32 %v2207_v22, %v3131_v14 }
 0x43b   :  { %v2209_v8 = vpop.eup %2208  ;;  %2218 = vrsqrt.f32 %v1483_v62  ;;  %v1484_v45 = vadd.f32 1e-05, %v1452_v55  ;;  %v1453_v39 = vmul.f32 0.015625, %v1389_v58 }
 0x43c   :  { %v1392_v47 = vpop.xlane.xlu0 %1391  ;;  %v1569_v33 = vpack.c.bf16 %v1541_v4, %v1540_v42  ;;  %v1542_v13 = vmul.f32 %v2209_v8, %v3137_v3 }
 0x43d   :  { %v2211_v34 = vpop.eup %2210  ;;  %2220 = vrsqrt.f32 %v1484_v45  ;;  %v1485_v24 = vadd.f32 1e-05, %v1453_v39  ;;  %v1454_v6 = vmul.f32 0.015625, %v1392_v47 }
 0x43e   :  { %v1395_v49 = vpop.xlane.xlu1 %1394  ;;  %2092 = vmatmul.mubr.msk.bf16.gmra.mrb[20].mxu0 %vm1148_vm6, %v1569_v33  ;;  %v1543_v0 = vmul.f32 %v2211_v34, %v3143_v12 }
 0x43f   :  { %v2213_v41 = vpop.eup %2212  ;;  %2222 = vrsqrt.f32 %v1485_v24  ;;  %v1486_v14 = vadd.f32 1e-05, %v1454_v6  ;;  %v1455_v17 = vmul.f32 0.015625, %v1395_v49 }
 0x440   :  { %v1398_v35 = vpop.xlane.xlu0 %1397  ;;  %v1570_v18 = vpack.c.bf16 %v1543_v0, %v1542_v13  ;;  %v1544_v43 = vmul.f32 %v2213_v41, %v3149_v10 }
 0x441   :  { %v2215_v26 = vpop.eup %2214  ;;  %2224 = vrsqrt.f32 %v1486_v14  ;;  %v1487_v11 = vadd.f32 1e-05, %v1455_v17  ;;  %v1456_v54 = vmul.f32 0.015625, %v1398_v35 }
 0x442   :  { %v1401_v61 = vpop.xlane.xlu1 %1400  ;;  %2095 = vmatprep.mubr.msk.bf16.mxu0 %vm1148_vm6, %v1570_v18  ;;  %v1545_v57 = vmul.f32 %v2215_v26, %v3155_v46 }
 0x443   :  { %v2217_v3 = vpop.eup %2216  ;;  %2226 = vrsqrt.f32 %v1487_v11  ;;  %v1488_v12 = vadd.f32 1e-05, %v1456_v54  ;;  %v1457_v29 = vmul.f32 0.015625, %v1401_v61 }
 0x444   :  { %v1404_v63 = vpop.xlane.xlu0 %1403  ;;  %v1571_v16 = vpack.c.bf16 %v1545_v57, %v1544_v43  ;;  %v1546_v60 = vmul.f32 %v2217_v3, %v3164_v7 }
 0x445   :  { %v2219_v2 = vpop.eup %2218  ;;  %2228 = vrsqrt.f32 %v1488_v12  ;;  %v1489_v40 = vadd.f32 1e-05, %v1457_v29  ;;  %v1458_v59 = vmul.f32 0.015625, %v1404_v63 }
 0x446   :  { %v1407_v19 = vpop.xlane.xlu1 %1406  ;;  %2096 = vmatmul.mubr.msk.bf16.gmra.mrb[24].mxu0 %vm1148_vm6, %v1571_v16  ;;  %v1547_v52 = vmul.f32 %v2219_v2, %v3170_v25 }
 0x447   :  { %v2221_v10 = vpop.eup %2220  ;;  %2230 = vrsqrt.f32 %v1489_v40  ;;  %v1490_v46 = vadd.f32 1e-05, %v1458_v59  ;;  %v1459_v28 = vmul.f32 0.015625, %v1407_v19 }
 0x448   :  { %v1410_v38 = vpop.xlane.xlu0 %1409  ;;  %v1572_v37 = vpack.c.bf16 %v1547_v52, %v1546_v60  ;;  %v1548_v42 = vmul.f32 %v2221_v10, %v3176_v23 }
 0x449   :  { %v2223_v22 = vpop.eup %2222  ;;  %2232 = vrsqrt.f32 %v1490_v46  ;;  %v1491_v62 = vadd.f32 1e-05, %v1459_v28  ;;  %v1460_v55 = vmul.f32 0.015625, %v1410_v38 }
 0x44a   :  { %v1413_v58 = vpop.xlane.xlu1 %1412  ;;  %2099 = vmatprep.mubr.msk.bf16.mxu0 %vm1148_vm6, %v1572_v37  ;;  %v1549_v4 = vmul.f32 %v2223_v22, %v3182_v20 }
 0x44b   :  { %v2225_v7 = vpop.eup %2224  ;;  %2234 = vrsqrt.f32 %v1491_v62  ;;  %v1492_v25 = vadd.f32 1e-05, %v1460_v55  ;;  %v1461_v8 = vmul.f32 0.015625, %v1413_v58 }
 0x44c   :  { %v1416_v45 = vpop.xlane.xlu0 %1415  ;;  %v1573_v39 = vpack.c.bf16 %v1549_v4, %v1548_v42  ;;  %v1550_v6 = vmul.f32 %v2225_v7, %v3188_v15 }
 0x44d   :  { %v2227_v47 = vpop.eup %2226  ;;  %2236 = vrsqrt.f32 %v1492_v25  ;;  %v1493_v33 = vadd.f32 1e-05, %v1461_v8  ;;  %v1462_v34 = vmul.f32 0.015625, %v1416_v45 }
 0x44e   :  { %v1419_v24 = vpop.xlane.xlu1 %1418  ;;  %2100 = vmatmul.mubr.msk.bf16.gmra.mrb[28].mxu0 %vm1148_vm6, %v1573_v39  ;;  %v1551_v49 = vmul.f32 %v2227_v47, %v3194_v1 }
 0x44f   :  { %v2229_v23 = vpop.eup %2228  ;;  %2238 = vrsqrt.f32 %v1493_v33  ;;  %v1494_v20 = vadd.f32 1e-05, %v1462_v34  ;;  %v1463_v13 = vmul.f32 0.015625, %v1419_v24 }
 0x450   :  { %v1422_v0 = vpop.xlane.xlu0 %1421  ;;  %v1574_v41 = vpack.c.bf16 %v1551_v49, %v1550_v6  ;;  %v1552_v26 = vmul.f32 %v2229_v23, %v3203_v5 }
 0x451   :  { %v2231_v14 = vpop.eup %2230  ;;  %2240 = vrsqrt.f32 %v1494_v20  ;;  %v1495_v17 = vadd.f32 1e-05, %v1463_v13  ;;  %v1464_v35 = vmul.f32 0.015625, %v1422_v0 }
 0x452   :  { %v1425_v18 = vpop.xlane.xlu1 %1424  ;;  %2103 = vmatprep.mubr.msk.bf16.mxu0 %vm1148_vm6, %v1574_v41  ;;  %v1553_v11 = vmul.f32 %v2231_v14, %v3209_v30 }
 0x453   :  { %v2233_v15 = vpop.eup %2232  ;;  %2242 = vrsqrt.f32 %v1495_v17  ;;  %v1496_v1 = vadd.f32 1e-05, %v1464_v35  ;;  %v1465_v54 = vmul.f32 0.015625, %v1425_v18 }
 0x454   :  { %v1428_v61 = vpop.xlane.xlu0 %1427  ;;  %v1575_v43 = vpack.c.bf16 %v1553_v11, %v1552_v26  ;;  %v1554_v63 = vmul.f32 %v2233_v15, %v3218_v56 }
 0x455   :  { %v2235_v57 = vpop.eup %2234  ;;  %2244 = vrsqrt.f32 %v1496_v1  ;;  %v1497_v3 = vadd.f32 1e-05, %v1465_v54  ;;  %v1466_v12 = vmul.f32 0.015625, %v1428_v61 }
 0x456   :  { %v1431_v29 = vpop.xlane.xlu1 %1430  ;;  %2104 = vmatmul.mubr.msk.bf16.gmra.mrb[32].mxu0 %vm1148_vm6, %v1575_v43  ;;  %v1555_v16 = vmul.f32 %v2235_v57, %v3224_v27 }
 0x457   :  { %v2237_v5 = vpop.eup %2236  ;;  %2246 = vrsqrt.f32 %v1497_v3  ;;  %v1498_v30 = vadd.f32 1e-05, %v1466_v12  ;;  %v1467_v2 = vmul.f32 0.015625, %v1431_v29 }
 0x458   :  { %v1434_v40 = vpop.xlane.xlu0 %1433  ;;  %v1576_v59 = vpack.c.bf16 %v1555_v16, %v1554_v63  ;;  %v1556_v46 = vmul.f32 %v2237_v5, %v3230_v53 }
 0x459   :  { %v2239_v19 = vpop.eup %2238  ;;  %2248 = vrsqrt.f32 %v1498_v30  ;;  %v1499_v60 = vadd.f32 1e-05, %v1467_v2  ;;  %v1468_v52 = vmul.f32 0.015625, %v1434_v40 }
 0x45a   :  { %v1437_v10 = vpop.xlane.xlu1 %1436  ;;  %2107 = vmatprep.mubr.msk.bf16.mxu0 %vm1148_vm6, %v1576_v59  ;;  %v1557_v28 = vmul.f32 %v2239_v19, %v3236_v32 }
 0x45b   :  { %v2241_v56 = vpop.eup %2240  ;;  %2250 = vrsqrt.f32 %v1499_v60  ;;  %v1500_v27 = vadd.f32 1e-05, %v1468_v52  ;;  %v1469_v38 = vmul.f32 0.015625, %v1437_v10 }
 0x45c   :  { %v1577_v37 = vpack.c.bf16 %v1557_v28, %v1556_v46  ;;  %v1558_v55 = vmul.f32 %v2241_v56, %v3242_v48 }
 0x45d   :  { %v2243_v22 = vpop.eup %2242  ;;  %2252 = vrsqrt.f32 %v1500_v27  ;;  %v1501_v62 = vadd.f32 1e-05, %v1469_v38 }
 0x45e   :  { %2108 = vmatmul.mubr.msk.bf16.gmra.mrb[36].mxu0 %vm1148_vm6, %v1577_v37  ;;  %v1559_v58 = vmul.f32 %v2243_v22, %v3248_v44 }
 0x45f   :  { %v2245_v42 = vpop.eup %2244  ;;  %2254 = vrsqrt.f32 %v1501_v62 }
 0x460   :  { %v1578_v4 = vpack.c.bf16 %v1559_v58, %v1558_v55  ;;  %v1560_v32 = vmul.f32 %v2245_v42, %v3254_v9 }
 0x461   :  { %v2247_v53 = vpop.eup %2246 }
 0x462   :  { %2111 = vmatprep.mubr.msk.bf16.mxu0 %vm1148_vm6, %v1578_v4  ;;  %v1561_v7 = vmul.f32 %v2247_v53, %v3260_v36  ;;  %v3344_v36 = vld [vmem:[%s3508_s4 + $0x2] ss:$0 sm:$0xff] }
 0x463   :  { %v2249_v25 = vpop.eup %2248 }
 0x464   :  { %v1579_v8 = vpack.c.bf16 %v1561_v7, %v1560_v32  ;;  %v1562_v39 = vmul.f32 %v2249_v25, %v3266_v31 }
 0x465   :  { %v2251_v45 = vpop.eup %2250 }
 0x466   :  { %2112 = vmatmul.mubr.msk.bf16.gmra.mrb[40].mxu0 %vm1148_vm6, %v1579_v8  ;;  %v1563_v48 = vmul.f32 %v2251_v45, %v3272_v51 }
 0x467   :  { %v2253_v44 = vpop.eup %2252 }
 0x468   :  { %v1580_v47 = vpack.c.bf16 %v1563_v48, %v1562_v39  ;;  %v1564_v34 = vmul.f32 %v2253_v44, %v3278_v50 }
 0x469   :  { %v2255_v33 = vpop.eup %2254 }
 0x46a   :  { %2115 = vmatprep.mubr.msk.bf16.mxu0 %vm1148_vm6, %v1580_v47  ;;  %v1565_v9 = vmul.f32 %v2255_v33, %v3284_v21 }
 0x46c   :  { %v1581_v24 = vpack.c.bf16 %v1565_v9, %v1564_v34 }
 0x46e   :  { %2116 = vmatmul.mubr.msk.bf16.gmra.mrb[44].mxu0 %vm1148_vm6, %v1581_v24 }
 0x509   :  { %v2089_v31 = vpop.f32.mrb[16].mxu0 }
 0x50a   :  { %v1710_v51 = vadd.f32 %v2089_v31, %v3344_v36  ;;  %v1701_v6 = vpop.f32.mrb[17].mxu0 }
 0x50b   :  { %v1702_v49 = vadd.f32 %v3344_v36, %v1701_v6  ;;  %v2090_v23 = vpop.f32.mrb[18].mxu0 }
 0x50c   :  { %2256 = vtanh.f32 %v1710_v51  ;;  %v1713_v50 = vadd.f32 %v2090_v23, %v3344_v36  ;;  %v1704_v20 = vpop.f32.mrb[19].mxu0 }
 0x50d   :  { %2258 = vtanh.f32 %v1702_v49  ;;  %v1705_v21 = vadd.f32 %v3344_v36, %v1704_v20 }
 0x50e   :  { %2260 = vtanh.f32 %v1713_v50 }
 0x50f   :  { %2262 = vtanh.f32 %v1705_v21 }
 0x511   :  { %v2093_v13 = vpop.f32.mrb[20].mxu0 }
 0x512   :  { %v1726_v0 = vadd.f32 %v2093_v13, %v3344_v36  ;;  %v1717_v41 = vpop.f32.mrb[21].mxu0 }
 0x513   :  { %v1718_v14 = vadd.f32 %v3344_v36, %v1717_v41  ;;  %v2094_v17 = vpop.f32.mrb[22].mxu0 }
 0x514   :  { %2264 = vtanh.f32 %v1726_v0  ;;  %v1729_v35 = vadd.f32 %v2094_v17, %v3344_v36  ;;  %v1720_v18 = vpop.f32.mrb[23].mxu0 }
 0x515   :  { %2266 = vtanh.f32 %v1718_v14  ;;  %v1721_v26 = vadd.f32 %v3344_v36, %v1720_v18 }
 0x516   :  { %v2257_v11 = vpop.eup %2256  ;;  %2268 = vtanh.f32 %v1729_v35 }
 0x517   :  { %v2259_v15 = vpop.eup %2258  ;;  %1862 = vst.msk [vmem:[%s3511_s5 + $0x10] sm:$0xff] %vm82_vm0, %v2257_v11  ;;  %2270 = vtanh.f32 %v1721_v26 }
 0x518   :  { %v2261_v1 = vpop.eup %2260  ;;  %1860 = vst.msk [vmem:[%s3511_s5] sm:$0xff] %vm82_vm0, %v2259_v15 }
 0x519   :  { %v2263_v54 = vpop.eup %2262  ;;  %1863 = vst.msk [vmem:[%s3511_s5 + $0x18] sm:$0xff] %vm82_vm0, %v2261_v1  ;;  %v2097_v61 = vpop.f32.mrb[24].mxu0 }
 0x51a   :  { %1861 = vst.msk [vmem:[%s3511_s5 + $0x8] sm:$0xff] %vm82_vm0, %v2263_v54  ;;  %v1742_v43 = vadd.f32 %v2097_v61, %v3344_v36  ;;  %v1733_v57 = vpop.f32.mrb[25].mxu0 }
 0x51b   :  { %v1734_v3 = vadd.f32 %v3344_v36, %v1733_v57  ;;  %v2098_v12 = vpop.f32.mrb[26].mxu0 }
 0x51c   :  { %2272 = vtanh.f32 %v1742_v43  ;;  %v1745_v29 = vadd.f32 %v2098_v12, %v3344_v36  ;;  %v1736_v63 = vpop.f32.mrb[27].mxu0 }
 0x51d   :  { %2274 = vtanh.f32 %v1734_v3  ;;  %v1737_v16 = vadd.f32 %v3344_v36, %v1736_v63 }
 0x51e   :  { %v2265_v5 = vpop.eup %2264  ;;  %2276 = vtanh.f32 %v1745_v29 }
 0x51f   :  { %v2267_v30 = vpop.eup %2266  ;;  %1866 = vst.msk [vmem:[%s3511_s5 + $0x30] sm:$0xff] %vm82_vm0, %v2265_v5  ;;  %2278 = vtanh.f32 %v1737_v16 }
 0x520   :  { %v2269_v2 = vpop.eup %2268  ;;  %1864 = vst.msk [vmem:[%s3511_s5 + $0x20] sm:$0xff] %vm82_vm0, %v2267_v30 }
 0x521   :  { %v2271_v40 = vpop.eup %2270  ;;  %1867 = vst.msk [vmem:[%s3511_s5 + $0x38] sm:$0xff] %vm82_vm0, %v2269_v2  ;;  %v2101_v59 = vpop.f32.mrb[28].mxu0 }
 0x522   :  { %1865 = vst.msk [vmem:[%s3511_s5 + $0x28] sm:$0xff] %vm82_vm0, %v2271_v40  ;;  %v1758_v19 = vadd.f32 %v2101_v59, %v3344_v36  ;;  %v1749_v60 = vpop.f32.mrb[29].mxu0 }
 0x523   :  { %v1750_v52 = vadd.f32 %v3344_v36, %v1749_v60  ;;  %v2102_v10 = vpop.f32.mrb[30].mxu0 }
 0x524   :  { %2280 = vtanh.f32 %v1758_v19  ;;  %v1761_v46 = vadd.f32 %v2102_v10, %v3344_v36  ;;  %v1752_v28 = vpop.f32.mrb[31].mxu0 }
 0x525   :  { %2282 = vtanh.f32 %v1750_v52  ;;  %v1753_v56 = vadd.f32 %v3344_v36, %v1752_v28 }
 0x526   :  { %v2273_v27 = vpop.eup %2272  ;;  %2284 = vtanh.f32 %v1761_v46 }
 0x527   :  { %v2275_v38 = vpop.eup %2274  ;;  %1870 = vst.msk [vmem:[%s3511_s5 + $0x50] sm:$0xff] %vm82_vm0, %v2273_v27  ;;  %2286 = vtanh.f32 %v1753_v56 }
 0x528   :  { %v2277_v37 = vpop.eup %2276  ;;  %1868 = vst.msk [vmem:[%s3511_s5 + $0x40] sm:$0xff] %vm82_vm0, %v2275_v38 }
 0x529   :  { %v2279_v22 = vpop.eup %2278  ;;  %1871 = vst.msk [vmem:[%s3511_s5 + $0x58] sm:$0xff] %vm82_vm0, %v2277_v37  ;;  %v2105_v62 = vpop.f32.mrb[32].mxu0 }
 0x52a   :  { %1869 = vst.msk [vmem:[%s3511_s5 + $0x48] sm:$0xff] %vm82_vm0, %v2279_v22  ;;  %v1774_v55 = vadd.f32 %v2105_v62, %v3344_v36  ;;  %v1765_v58 = vpop.f32.mrb[33].mxu0 }
 0x52b   :  { %v1766_v42 = vadd.f32 %v3344_v36, %v1765_v58  ;;  %v2106_v4 = vpop.f32.mrb[34].mxu0 }
 0x52c   :  { %2288 = vtanh.f32 %v1774_v55  ;;  %v1777_v53 = vadd.f32 %v2106_v4, %v3344_v36  ;;  %v1768_v32 = vpop.f32.mrb[35].mxu0 }
 0x52d   :  { %2290 = vtanh.f32 %v1766_v42  ;;  %v1769_v7 = vadd.f32 %v3344_v36, %v1768_v32 }
 0x52e   :  { %v2281_v25 = vpop.eup %2280  ;;  %2292 = vtanh.f32 %v1777_v53 }
 0x52f   :  { %v2283_v8 = vpop.eup %2282  ;;  %1874 = vst.msk [vmem:[%s3511_s5 + $0x70] sm:$0xff] %vm82_vm0, %v2281_v25  ;;  %2294 = vtanh.f32 %v1769_v7 }
 0x530   :  { %v2285_v45 = vpop.eup %2284  ;;  %1872 = vst.msk [vmem:[%s3511_s5 + $0x60] sm:$0xff] %vm82_vm0, %v2283_v8 }
 0x531   :  { %v2287_v39 = vpop.eup %2286  ;;  %1875 = vst.msk [vmem:[%s3511_s5 + $0x78] sm:$0xff] %vm82_vm0, %v2285_v45  ;;  %v2109_v48 = vpop.f32.mrb[36].mxu0 }
 0x532   :  { %1873 = vst.msk [vmem:[%s3511_s5 + $0x68] sm:$0xff] %vm82_vm0, %v2287_v39  ;;  %v1790_v44 = vadd.f32 %v2109_v48, %v3344_v36  ;;  %v1781_v47 = vpop.f32.mrb[37].mxu0 }
 0x533   :  { %v1782_v33 = vadd.f32 %v3344_v36, %v1781_v47  ;;  %v2110_v34 = vpop.f32.mrb[38].mxu0 }
 0x534   :  { %2296 = vtanh.f32 %v1790_v44  ;;  %v1793_v9 = vadd.f32 %v2110_v34, %v3344_v36  ;;  %v1784_v24 = vpop.f32.mrb[39].mxu0 }
 0x535   :  { %2298 = vtanh.f32 %v1782_v33  ;;  %v1785_v31 = vadd.f32 %v3344_v36, %v1784_v24 }
 0x536   :  { %v2289_v51 = vpop.eup %2288  ;;  %2300 = vtanh.f32 %v1793_v9 }
 0x537   :  { %v2291_v6 = vpop.eup %2290  ;;  %1878 = vst.msk [vmem:[%s3511_s5 + $0x90] sm:$0xff] %vm82_vm0, %v2289_v51  ;;  %2302 = vtanh.f32 %v1785_v31 }
 0x538   :  { %v2293_v49 = vpop.eup %2292  ;;  %1876 = vst.msk [vmem:[%s3511_s5 + $0x80] sm:$0xff] %vm82_vm0, %v2291_v6 }
 0x539   :  { %v2295_v23 = vpop.eup %2294  ;;  %1879 = vst.msk [vmem:[%s3511_s5 + $0x98] sm:$0xff] %vm82_vm0, %v2293_v49  ;;  %v2113_v50 = vpop.f32.mrb[40].mxu0 }
 0x53a   :  { %1877 = vst.msk [vmem:[%s3511_s5 + $0x88] sm:$0xff] %vm82_vm0, %v2295_v23  ;;  %v1806_v20 = vadd.f32 %v2113_v50, %v3344_v36  ;;  %v1797_v21 = vpop.f32.mrb[41].mxu0 }
 0x53b   :  { %v1798_v13 = vadd.f32 %v3344_v36, %v1797_v21  ;;  %v2114_v0 = vpop.f32.mrb[42].mxu0 }
 0x53c   :  { %2304 = vtanh.f32 %v1806_v20  ;;  %v1809_v41 = vadd.f32 %v2114_v0, %v3344_v36  ;;  %v1800_v14 = vpop.f32.mrb[43].mxu0 }
 0x53d   :  { %2306 = vtanh.f32 %v1798_v13  ;;  %v1801_v17 = vadd.f32 %v3344_v36, %v1800_v14 }
 0x53e   :  { %v2297_v35 = vpop.eup %2296  ;;  %2308 = vtanh.f32 %v1809_v41 }
 0x53f   :  { %v2299_v18 = vpop.eup %2298  ;;  %1882 = vst.msk [vmem:[%s3511_s5 + $0xb0] sm:$0xff] %vm82_vm0, %v2297_v35  ;;  %2310 = vtanh.f32 %v1801_v17 }
 0x540   :  { %v2301_v26 = vpop.eup %2300  ;;  %1880 = vst.msk [vmem:[%s3511_s5 + $0xa0] sm:$0xff] %vm82_vm0, %v2299_v18 }
 0x541   :  { %v2303_v11 = vpop.eup %2302  ;;  %1883 = vst.msk [vmem:[%s3511_s5 + $0xb8] sm:$0xff] %vm82_vm0, %v2301_v26  ;;  %v2117_v15 = vpop.f32.mrb[44].mxu0 }
 0x542   :  { %1881 = vst.msk [vmem:[%s3511_s5 + $0xa8] sm:$0xff] %vm82_vm0, %v2303_v11  ;;  %v1822_v1 = vadd.f32 %v2117_v15, %v3344_v36  ;;  %v1813_v54 = vpop.f32.mrb[45].mxu0 }
 0x543   :  { %v1814_v61 = vadd.f32 %v3344_v36, %v1813_v54  ;;  %v2118_v43 = vpop.f32.mrb[46].mxu0 }
 0x544   :  { %2312 = vtanh.f32 %v1822_v1  ;;  %v1825_v57 = vadd.f32 %v2118_v43, %v3344_v36  ;;  %v1816_v3 = vpop.f32.mrb[47].mxu0 }
 0x545   :  { %2314 = vtanh.f32 %v1814_v61  ;;  %v1817_v12 = vadd.f32 %v3344_v36, %v1816_v3 }
 0x546   :  { %v2305_v29 = vpop.eup %2304  ;;  %2316 = vtanh.f32 %v1825_v57 }
 0x547   :  { %v2307_v63 = vpop.eup %2306  ;;  %1886 = vst.msk [vmem:[%s3511_s5 + $0xd0] sm:$0xff] %vm82_vm0, %v2305_v29  ;;  %2318 = vtanh.f32 %v1817_v12 }
 0x548   :  { %v2309_v16 = vpop.eup %2308  ;;  %1884 = vst.msk [vmem:[%s3511_s5 + $0xc0] sm:$0xff] %vm82_vm0, %v2307_v63 }
 0x549   :  { %v2311_v5 = vpop.eup %2310  ;;  %1887 = vst.msk [vmem:[%s3511_s5 + $0xd8] sm:$0xff] %vm82_vm0, %v2309_v16 }
 0x54a   :  { %1885 = vst.msk [vmem:[%s3511_s5 + $0xc8] sm:$0xff] %vm82_vm0, %v2311_v5 }
 0x54e   :  { %v2313_v36 = vpop.eup %2312 }
 0x54f   :  { %v2315_v30 = vpop.eup %2314  ;;  %1890 = vst.msk [vmem:[%s3511_s5 + $0xf0] sm:$0xff] %vm82_vm0, %v2313_v36 }
 0x550   :  { %v2317_v2 = vpop.eup %2316  ;;  %1888 = vst.msk [vmem:[%s3511_s5 + $0xe0] sm:$0xff] %vm82_vm0, %v2315_v30 }
 0x551   :  { %v2319_v40 = vpop.eup %2318  ;;  %1891 = vst.msk [vmem:[%s3511_s5 + $0xf8] sm:$0xff] %vm82_vm0, %v2317_v2 }
 0x552   :  { %1889 = vst.msk [vmem:[%s3511_s5 + $0xe8] sm:$0xff] %vm82_vm0, %v2319_v40 }

</bundles_post_ra>
